<compile_context>
chip_gen: v7x
topology: tpu7x:2x2x1
jax: 0.10.0
libtpu: 0.0.40
codegen_flags: <defaults>
</compile_context>

<pallas_src>
import math
import jax
import jax.numpy as jnp
from jax.experimental import pallas as pl
from jax.experimental.pallas import tpu as pltpu


# ----------------------------------------------------------------------------
# Fused kernel: one batch element per grid step.
# ----------------------------------------------------------------------------
def gnn_trans_kernel(x_ref, ae_ref, wg_ref, wqkv_ref, bqkv_ref, wo_ref,
                     w1_ref, b1_ref, w2_ref, vec_ref, o_ref):
    """
    x_ref   : (1, N*T, C)    node-major features of this batch element (row = node*T + time)
    ae_ref  : (N*T, N*T)     kron(A, I_T) -- applies A to every time step in one matmul
    wg_ref  : (C, H)
    wqkv_ref: (H, 3H)        [Wq*scale | Wk | Wv],   bqkv_ref: (1, 3H)
    wo_ref  : (H, H)
    w1_ref  : (H, F), b1_ref: (1, F), w2_ref: (F, H)
    vec_ref : (7, H)   rows = [bg, bo, b2, ln1_gamma, ln1_beta, ln2_gamma, ln2_beta]
    o_ref   : (1, N*T, H)    rows ordered (node, time)
    """
    nt = x_ref.shape[1]
    h = wg_ref.shape[1]
    t = nt // ae_ref.shape[0] if False else None  # placeholder, real t below
    # static sizes
    n_nodes = 0  # filled from closure-free arithmetic below
    del t, n_nodes
    eps = 1e-5

    bg  = vec_ref[0:1, :]
    bo  = vec_ref[1:2, :]
    b2  = vec_ref[2:3, :]
    g1  = vec_ref[3:4, :]
    be1 = vec_ref[4:5, :]
    g2  = vec_ref[5:6, :]
    be2 = vec_ref[6:7, :]

    # ---------------- GCN:  relu(A @ (X_t @ Wg + bg))  for every time step --------------
    x = x_ref[0]                                                       # (N*T, C)
    xw = jnp.dot(x, wg_ref[...], preferred_element_type=jnp.float32) + bg       # (N*T, H)
    g = jnp.maximum(
        jnp.dot(ae_ref[...], xw, preferred_element_type=jnp.float32), 0.0)      # (N*T, H)

    # ---------------- single-head self-attention over time, per node --------------------
    # T is recovered statically from the block shapes (N*T rows, kron block of size T).
    # Here we use the fact that ae_ref is (N*T, N*T) and wqkv is (H, 3H); T and N come
    # from the wrapper via closure-free static shapes: encode T in q/k/v reshape.
    T_static = gnn_trans_kernel._T          # set by wrapper before pallas_call
    N_static = nt // T_static

    qkv = jnp.dot(g, wqkv_ref[...], preferred_element_type=jnp.float32) + bqkv_ref[...]
    q = qkv[:, 0:h].reshape(N_static, T_static, h)   # 1/sqrt(H) already folded into Wq/bq
    k = qkv[:, h:2 * h].reshape(N_static, T_static, h)
    v = qkv[:, 2 * h:3 * h].reshape(N_static, T_static, h)

    s = jnp.einsum('ntd,nud->ntu', q, k, preferred_element_type=jnp.float32)    # (N, T, T)
    m = jnp.max(s, axis=-1, keepdims=True)
    e = jnp.exp(s - m)
    p = e * pl.reciprocal(jnp.sum(e, axis=-1, keepdims=True), approx=True)

    ctx = jnp.einsum('ntu,nud->ntd', p, v, preferred_element_type=jnp.float32)  # (N, T, H)
    attn = jnp.dot(ctx.reshape(nt, h), wo_ref[...],
                   preferred_element_type=jnp.float32) + bo

    # residual + LayerNorm 1  (post-norm, as in the standard PyTorch encoder layer)
    r1 = g + attn
    mu1 = jnp.mean(r1, axis=-1, keepdims=True)
    var1 = jnp.mean((r1 - mu1) * (r1 - mu1), axis=-1, keepdims=True)
    h1 = (r1 - mu1) * jax.lax.rsqrt(var1 + eps) * g1 + be1

    # feed-forward
    f = jnp.dot(h1, w1_ref[...], preferred_element_type=jnp.float32) + b1_ref[...]
    f = jnp.maximum(f, 0.0)
    f = jnp.dot(f, w2_ref[...], preferred_element_type=jnp.float32) + b2

    # residual + LayerNorm 2
    r2 = h1 + f
    mu2 = jnp.mean(r2, axis=-1, keepdims=True)
    var2 = jnp.mean((r2 - mu2) * (r2 - mu2), axis=-1, keepdims=True)
    o_ref[0] = (r2 - mu2) * jax.lax.rsqrt(var2 + eps) * g2 + be2


# ----------------------------------------------------------------------------
# Full GNN_Trans forward (wrapper: parameter packing + one pallas_call)
# ----------------------------------------------------------------------------
def gnn_trans_forward(features, A, gcn_params, tr_params, pool=False):
    B, T, N, C = features.shape
    H = gcn_params["Wg"].shape[1]
    F = tr_params["w1"].shape[1]
    scale = 1.0 / math.sqrt(H)

    # node-major layout so each (batch, node) time series is contiguous;
    # flatten (N, T) -> rows in the wrapper (free in XLA, no in-kernel reshape of x).
    x_nt = jnp.transpose(features, (0, 2, 1, 3)).reshape(B, N * T, C)  # (B, N*T, C)

    # kron(A, I_T): one 2D matmul applies A to every time step at once
    Ae = jnp.kron(A, jnp.eye(T, dtype=A.dtype))                        # (N*T, N*T)

    # fused QKV projection, attention scale folded into the Q part
    Wqkv = jnp.concatenate(
        [tr_params["wq"] * scale, tr_params["wk"], tr_params["wv"]], axis=1)   # (H, 3H)
    bqkv = jnp.concatenate(
        [tr_params["bq"] * scale, tr_params["bk"], tr_params["bv"]], axis=1)   # (1, 3H)

    # pack all (1, H) vectors into one slab: [bg, bo, b2, g1, be1, g2, be2]
    vecs = jnp.concatenate(
        [gcn_params["bg"], tr_params["bo"], tr_params["b2"],
         tr_params["g1"], tr_params["be1"], tr_params["g2"], tr_params["be2"]],
        axis=0)                                                        # (7, H)

    def const2d(shp):
        return pl.BlockSpec(shp, lambda b: (0, 0))

    # static T for the in-kernel (N*T,·) -> (N,T,·) split of q/k/v
    gnn_trans_kernel._T = T

    out = pl.pallas_call(
        gnn_trans_kernel,
        out_shape=jax.ShapeDtypeStruct((B, N * T, H), jnp.float32),
        grid=(B,),
        in_specs=[
            pl.BlockSpec((1, N * T, C), lambda b: (b, 0, 0)),
            const2d((N * T, N * T)),
            const2d((C, H)),
            const2d((H, 3 * H)), const2d((1, 3 * H)),
            const2d((H, H)),
            const2d((H, F)), const2d((1, F)),
            const2d((F, H)),
            const2d((7, H)),
        ],
        out_specs=pl.BlockSpec((1, N * T, H), lambda b: (b, 0, 0)),
        compiler_params=pltpu.CompilerParams(
            dimension_semantics=("parallel",)),   # batch axis parallel -> 2 TCs on v7x
    )(x_nt, Ae, gcn_params["Wg"], Wqkv, bqkv, tr_params["wo"],
      tr_params["w1"], tr_params["b1"], tr_params["w2"], vecs)

    # (B, N*T, H) -> (B, T, N, H)  (tiny output-layout plumbing in the wrapper)
    y = jnp.transpose(out.reshape(B, N, T, H), (0, 2, 1, 3))
    if pool:
        y = jnp.mean(y, axis=1)                  # pool over time -> (B, N, H)
    return y


# ----------------------------------------------------------------------------
# Deterministic parameter construction
# ----------------------------------------------------------------------------
def make_params(key, in_channel, hidden_size, filter_size):
    ks = jax.random.split(key, 8)
    sc = 0.1
    gcn_params = {
        "Wg": sc * jax.random.normal(ks[0], (in_channel, hidden_size), jnp.float32),
        "bg": jnp.zeros((1, hidden_size), jnp.float32),
    }
    tr_params = {
        "wq": sc * jax.random.normal(ks[1], (hidden_size, hidden_size), jnp.float32),
        "bq": jnp.zeros((1, hidden_size), jnp.float32),
        "wk": sc * jax.random.normal(ks[2], (hidden_size, hidden_size), jnp.float32),
        "bk": jnp.zeros((1, hidden_size), jnp.float32),
        "wv": sc * jax.random.normal(ks[3], (hidden_size, hidden_size), jnp.float32),
        "bv": jnp.zeros((1, hidden_size), jnp.float32),
        "wo": sc * jax.random.normal(ks[4], (hidden_size, hidden_size), jnp.float32),
        "bo": jnp.zeros((1, hidden_size), jnp.float32),
        "w1": sc * jax.random.normal(ks[5], (hidden_size, filter_size), jnp.float32),
        "b1": jnp.zeros((1, filter_size), jnp.float32),
        "w2": sc * jax.random.normal(ks[6], (filter_size, hidden_size), jnp.float32),
        "b2": jnp.zeros((1, hidden_size), jnp.float32),
        "g1": jnp.ones((1, hidden_size), jnp.float32),
        "be1": jnp.zeros((1, hidden_size), jnp.float32),
        "g2": jnp.ones((1, hidden_size), jnp.float32),
        "be2": jnp.zeros((1, hidden_size), jnp.float32),
    }
    return gcn_params, tr_params


if __name__ == "__main__":
    B, T, N, C = 2, 8, 16, 4        # batch, time, num_nodes, in_channel
    H, F = 32, 64                   # hidden_size, filter_size

    key = jax.random.PRNGKey(0)
    k_feat, k_adj, k_par = jax.random.split(key, 3)

    features = jax.random.normal(k_feat, (B, T, N, C), jnp.float32)

    # deterministic row-normalized adjacency with self loops
    A = jnp.abs(jax.random.normal(k_adj, (N, N), jnp.float32))
    A = A + A.T + jnp.eye(N, dtype=jnp.float32)
    A = A / jnp.sum(A, axis=-1, keepdims=True)

    gcn_params, tr_params = make_params(k_par, C, H, F)

    fwd = jax.jit(lambda feats, adj, gp, tp: gnn_trans_forward(feats, adj, gp, tp, pool=False))
    out = jax.block_until_ready(fwd(features, A, gcn_params, tr_params))

    assert out.shape == (B, T, N, H), out.shape
    assert bool(jnp.all(jnp.isfinite(out)))
    # TODO(synk): self.batch_norm is defined in __init__ but unused in forward; omitted here.
    print("KERNEL_OK")
</pallas_src>

<mosaic_0001>
module attributes {stable_mosaic.version = 11 : i64} {
  func.func @gnn_trans_kernel(%arg0: i32, %arg1: memref<1x128x4xf32, #tpu.memory_space<vmem>>, %arg2: memref<128x128xf32, #tpu.memory_space<vmem>>, %arg3: memref<4x32xf32, #tpu.memory_space<vmem>>, %arg4: memref<32x96xf32, #tpu.memory_space<vmem>>, %arg5: memref<1x96xf32, #tpu.memory_space<vmem>>, %arg6: memref<32x32xf32, #tpu.memory_space<vmem>>, %arg7: memref<32x64xf32, #tpu.memory_space<vmem>>, %arg8: memref<1x64xf32, #tpu.memory_space<vmem>>, %arg9: memref<64x32xf32, #tpu.memory_space<vmem>>, %arg10: memref<7x32xf32, #tpu.memory_space<vmem>>, %arg11: memref<1x128x32xf32, #tpu.memory_space<vmem>>) attributes {dimension_semantics = [#tpu.dimension_semantics<parallel>], iteration_bounds = array<i64: 2>, scalar_prefetch = 0 : i64, scratch_operands = 0 : i64, tpu.core_type = #tpu.core_type<tc>, window_params = [{transform_indices = @transform_0, window_bounds = array<i64: 1, 128, 4>}, {pipeline_mode = #tpu.pipeline_mode<synchronous>, transform_indices = @transform_1, window_bounds = array<i64: 128, 128>}, {pipeline_mode = #tpu.pipeline_mode<synchronous>, transform_indices = @transform_2, window_bounds = array<i64: 4, 32>}, {pipeline_mode = #tpu.pipeline_mode<synchronous>, transform_indices = @transform_3, window_bounds = array<i64: 32, 96>}, {pipeline_mode = #tpu.pipeline_mode<synchronous>, transform_indices = @transform_4, window_bounds = array<i64: 1, 96>}, {pipeline_mode = #tpu.pipeline_mode<synchronous>, transform_indices = @transform_5, window_bounds = array<i64: 32, 32>}, {pipeline_mode = #tpu.pipeline_mode<synchronous>, transform_indices = @transform_6, window_bounds = array<i64: 32, 64>}, {pipeline_mode = #tpu.pipeline_mode<synchronous>, transform_indices = @transform_7, window_bounds = array<i64: 1, 64>}, {pipeline_mode = #tpu.pipeline_mode<synchronous>, transform_indices = @transform_8, window_bounds = array<i64: 64, 32>}, {pipeline_mode = #tpu.pipeline_mode<synchronous>, transform_indices = @transform_9, window_bounds = array<i64: 7, 32>}, {transform_indices = @transform_10, window_bounds = array<i64: 1, 128, 32>}]} {
    %c0 = arith.constant 0 : index
    %c0_0 = arith.constant 0 : index
    %0 = vector.load %arg10[%c0, %c0_0] : memref<7x32xf32, #tpu.memory_space<vmem>>, vector<1x32xf32>
    %c1 = arith.constant 1 : index
    %c0_1 = arith.constant 0 : index
    %1 = vector.load %arg10[%c1, %c0_1] : memref<7x32xf32, #tpu.memory_space<vmem>>, vector<1x32xf32>
    %c2 = arith.constant 2 : index
    %c0_2 = arith.constant 0 : index
    %2 = vector.load %arg10[%c2, %c0_2] : memref<7x32xf32, #tpu.memory_space<vmem>>, vector<1x32xf32>
    %c3 = arith.constant 3 : index
    %c0_3 = arith.constant 0 : index
    %3 = vector.load %arg10[%c3, %c0_3] : memref<7x32xf32, #tpu.memory_space<vmem>>, vector<1x32xf32>
    %c4 = arith.constant 4 : index
    %c0_4 = arith.constant 0 : index
    %4 = vector.load %arg10[%c4, %c0_4] : memref<7x32xf32, #tpu.memory_space<vmem>>, vector<1x32xf32>
    %c5 = arith.constant 5 : index
    %c0_5 = arith.constant 0 : index
    %5 = vector.load %arg10[%c5, %c0_5] : memref<7x32xf32, #tpu.memory_space<vmem>>, vector<1x32xf32>
    %c6 = arith.constant 6 : index
    %c0_6 = arith.constant 0 : index
    %6 = vector.load %arg10[%c6, %c0_6] : memref<7x32xf32, #tpu.memory_space<vmem>>, vector<1x32xf32>
    %c0_7 = arith.constant 0 : index
    %c0_8 = arith.constant 0 : index
    %c0_9 = arith.constant 0 : index
    %7 = vector.load %arg1[%c0_7, %c0_8, %c0_9] : memref<1x128x4xf32, #tpu.memory_space<vmem>>, vector<1x128x4xf32>
    %8 = vector.shape_cast %7 : vector<1x128x4xf32> to vector<128x4xf32>
    %c0_10 = arith.constant 0 : index
    %c0_11 = arith.constant 0 : index
    %9 = vector.load %arg3[%c0_10, %c0_11] : memref<4x32xf32, #tpu.memory_space<vmem>>, vector<4x32xf32>
    %cst = arith.constant dense<0.000000e+00> : vector<128x32xf32>
    %10 = tpu.matmul %8, %9, %cst {dimension_numbers = #tpu.dot_dimension_numbers<[1], [0], [0], [1], [0, 0, 1, 1], [], []>} : vector<128x4xf32>, vector<4x32xf32>, vector<128x32xf32> -> vector<128x32xf32>
    %11 = vector.broadcast %0 : vector<1x32xf32> to vector<128x32xf32>
    %12 = arith.addf %10, %11 : vector<128x32xf32>
    %c0_12 = arith.constant 0 : index
    %c0_13 = arith.constant 0 : index
    %13 = vector.load %arg2[%c0_12, %c0_13] : memref<128x128xf32, #tpu.memory_space<vmem>>, vector<128x128xf32>
    %cst_14 = arith.constant dense<0.000000e+00> : vector<128x32xf32>
    %14 = tpu.matmul %13, %12, %cst_14 {dimension_numbers = #tpu.dot_dimension_numbers<[1], [0], [0], [1], [0, 0, 1, 1], [], []>} : vector<128x128xf32>, vector<128x32xf32>, vector<128x32xf32> -> vector<128x32xf32>
    %cst_15 = arith.constant 0.000000e+00 : f32
    %15 = vector.broadcast %cst_15 : f32 to vector<128x32xf32>
    %16 = arith.maximumf %14, %15 : vector<128x32xf32>
    %c0_16 = arith.constant 0 : index
    %c0_17 = arith.constant 0 : index
    %17 = vector.load %arg4[%c0_16, %c0_17] : memref<32x96xf32, #tpu.memory_space<vmem>>, vector<32x96xf32>
    %cst_18 = arith.constant dense<0.000000e+00> : vector<128x96xf32>
    %18 = tpu.matmul %16, %17, %cst_18 {dimension_numbers = #tpu.dot_dimension_numbers<[1], [0], [0], [1], [0, 0, 1, 1], [], []>} : vector<128x32xf32>, vector<32x96xf32>, vector<128x96xf32> -> vector<128x96xf32>
    %c0_19 = arith.constant 0 : index
    %c0_20 = arith.constant 0 : index
    %19 = vector.load %arg5[%c0_19, %c0_20] : memref<1x96xf32, #tpu.memory_space<vmem>>, vector<1x96xf32>
    %20 = vector.broadcast %19 : vector<1x96xf32> to vector<128x96xf32>
    %21 = arith.addf %18, %20 : vector<128x96xf32>
    %22 = vector.extract_strided_slice %21 {offsets = [0, 0], sizes = [128, 32], strides = [1, 1]} : vector<128x96xf32> to vector<128x32xf32>
    %23 = vector.shape_cast %22 : vector<128x32xf32> to vector<16x8x32xf32>
    %24 = vector.extract_strided_slice %21 {offsets = [0, 32], sizes = [128, 32], strides = [1, 1]} : vector<128x96xf32> to vector<128x32xf32>
    %25 = vector.shape_cast %24 : vector<128x32xf32> to vector<16x8x32xf32>
    %26 = vector.extract_strided_slice %21 {offsets = [0, 64], sizes = [128, 32], strides = [1, 1]} : vector<128x96xf32> to vector<128x32xf32>
    %27 = vector.shape_cast %26 : vector<128x32xf32> to vector<16x8x32xf32>
    "tpu.trace_start"() <{level = 10 : i32, message = "ntd,nud->ntu"}> : () -> ()
    %cst_21 = arith.constant dense<0.000000e+00> : vector<16x8x8xf32>
    %28 = tpu.matmul %23, %25, %cst_21 {dimension_numbers = #tpu.dot_dimension_numbers<[2], [2], [1], [1], [0, 0, 0, 1, 1, 1], [0], [0]>} : vector<16x8x32xf32>, vector<16x8x32xf32>, vector<16x8x8xf32> -> vector<16x8x8xf32>
    "tpu.trace_stop"() : () -> ()
    %cst_22 = arith.constant dense<0xFF800000> : vector<16x8xf32>
    %29 = vector.multi_reduction <maximumf>, %28, %cst_22 [2] : vector<16x8x8xf32> to vector<16x8xf32>
    %30 = vector.shape_cast %29 : vector<16x8xf32> to vector<16x8x1xf32>
    %31 = vector.broadcast %30 : vector<16x8x1xf32> to vector<16x8x8xf32>
    %32 = arith.subf %28, %31 : vector<16x8x8xf32>
    %33 = math.exp %32 : vector<16x8x8xf32>
    %cst_23 = arith.constant dense<0.000000e+00> : vector<16x8xf32>
    %34 = vector.multi_reduction <add>, %33, %cst_23 [2] : vector<16x8x8xf32> to vector<16x8xf32>
    %35 = vector.shape_cast %34 : vector<16x8xf32> to vector<16x8x1xf32>
    %36 = tpu.reciprocal %35 {approx = true} : vector<16x8x1xf32> -> vector<16x8x1xf32>
    %37 = vector.broadcast %36 : vector<16x8x1xf32> to vector<16x8x8xf32>
    %38 = arith.mulf %33, %37 : vector<16x8x8xf32>
    "tpu.trace_start"() <{level = 10 : i32, message = "ntu,nud->ntd"}> : () -> ()
    %cst_24 = arith.constant dense<0.000000e+00> : vector<16x8x32xf32>
    %39 = tpu.matmul %38, %27, %cst_24 {dimension_numbers = #tpu.dot_dimension_numbers<[2], [1], [1], [2], [0, 0, 0, 1, 1, 2], [0], [0]>} : vector<16x8x8xf32>, vector<16x8x32xf32>, vector<16x8x32xf32> -> vector<16x8x32xf32>
    "tpu.trace_stop"() : () -> ()
    %40 = vector.shape_cast %39 : vector<16x8x32xf32> to vector<128x32xf32>
    %c0_25 = arith.constant 0 : index
    %c0_26 = arith.constant 0 : index
    %41 = vector.load %arg6[%c0_25, %c0_26] : memref<32x32xf32, #tpu.memory_space<vmem>>, vector<32x32xf32>
    %cst_27 = arith.constant dense<0.000000e+00> : vector<128x32xf32>
    %42 = tpu.matmul %40, %41, %cst_27 {dimension_numbers = #tpu.dot_dimension_numbers<[1], [0], [0], [1], [0, 0, 1, 1], [], []>} : vector<128x32xf32>, vector<32x32xf32>, vector<128x32xf32> -> vector<128x32xf32>
    %43 = vector.broadcast %1 : vector<1x32xf32> to vector<128x32xf32>
    %44 = arith.addf %42, %43 : vector<128x32xf32>
    %45 = arith.addf %16, %44 : vector<128x32xf32>
    %cst_28 = arith.constant dense<0.000000e+00> : vector<128xf32>
    %46 = vector.multi_reduction <add>, %45, %cst_28 [1] : vector<128x32xf32> to vector<128xf32>
    %47 = vector.shape_cast %46 : vector<128xf32> to vector<128x1xf32>
    %cst_29 = arith.constant 3.200000e+01 : f32
    %48 = vector.broadcast %cst_29 : f32 to vector<128x1xf32>
    %49 = arith.divf %47, %48 : vector<128x1xf32>
    %50 = vector.broadcast %49 : vector<128x1xf32> to vector<128x32xf32>
    %51 = arith.subf %45, %50 : vector<128x32xf32>
    %52 = vector.broadcast %49 : vector<128x1xf32> to vector<128x32xf32>
    %53 = arith.subf %45, %52 : vector<128x32xf32>
    %54 = arith.mulf %51, %53 : vector<128x32xf32>
    %cst_30 = arith.constant dense<0.000000e+00> : vector<128xf32>
    %55 = vector.multi_reduction <add>, %54, %cst_30 [1] : vector<128x32xf32> to vector<128xf32>
    %56 = vector.shape_cast %55 : vector<128xf32> to vector<128x1xf32>
    %cst_31 = arith.constant 3.200000e+01 : f32
    %57 = vector.broadcast %cst_31 : f32 to vector<128x1xf32>
    %58 = arith.divf %56, %57 : vector<128x1xf32>
    %59 = vector.broadcast %49 : vector<128x1xf32> to vector<128x32xf32>
    %60 = arith.subf %45, %59 : vector<128x32xf32>
    %cst_32 = arith.constant 9.99999974E-6 : f32
    %61 = vector.broadcast %cst_32 : f32 to vector<128x1xf32>
    %62 = arith.addf %58, %61 : vector<128x1xf32>
    %63 = math.rsqrt %62 : vector<128x1xf32>
    %64 = vector.broadcast %63 : vector<128x1xf32> to vector<128x32xf32>
    %65 = arith.mulf %60, %64 : vector<128x32xf32>
    %66 = vector.broadcast %3 : vector<1x32xf32> to vector<128x32xf32>
    %67 = arith.mulf %65, %66 : vector<128x32xf32>
    %68 = vector.broadcast %4 : vector<1x32xf32> to vector<128x32xf32>
    %69 = arith.addf %67, %68 : vector<128x32xf32>
    %c0_33 = arith.constant 0 : index
    %c0_34 = arith.constant 0 : index
    %70 = vector.load %arg7[%c0_33, %c0_34] : memref<32x64xf32, #tpu.memory_space<vmem>>, vector<32x64xf32>
    %cst_35 = arith.constant dense<0.000000e+00> : vector<128x64xf32>
    %71 = tpu.matmul %69, %70, %cst_35 {dimension_numbers = #tpu.dot_dimension_numbers<[1], [0], [0], [1], [0, 0, 1, 1], [], []>} : vector<128x32xf32>, vector<32x64xf32>, vector<128x64xf32> -> vector<128x64xf32>
    %c0_36 = arith.constant 0 : index
    %c0_37 = arith.constant 0 : index
    %72 = vector.load %arg8[%c0_36, %c0_37] : memref<1x64xf32, #tpu.memory_space<vmem>>, vector<1x64xf32>
    %73 = vector.broadcast %72 : vector<1x64xf32> to vector<128x64xf32>
    %74 = arith.addf %71, %73 : vector<128x64xf32>
    %cst_38 = arith.constant 0.000000e+00 : f32
    %75 = vector.broadcast %cst_38 : f32 to vector<128x64xf32>
    %76 = arith.maximumf %74, %75 : vector<128x64xf32>
    %c0_39 = arith.constant 0 : index
    %c0_40 = arith.constant 0 : index
    %77 = vector.load %arg9[%c0_39, %c0_40] : memref<64x32xf32, #tpu.memory_space<vmem>>, vector<64x32xf32>
    %cst_41 = arith.constant dense<0.000000e+00> : vector<128x32xf32>
    %78 = tpu.matmul %76, %77, %cst_41 {dimension_numbers = #tpu.dot_dimension_numbers<[1], [0], [0], [1], [0, 0, 1, 1], [], []>} : vector<128x64xf32>, vector<64x32xf32>, vector<128x32xf32> -> vector<128x32xf32>
    %79 = vector.broadcast %2 : vector<1x32xf32> to vector<128x32xf32>
    %80 = arith.addf %78, %79 : vector<128x32xf32>
    %81 = arith.addf %69, %80 : vector<128x32xf32>
    %cst_42 = arith.constant dense<0.000000e+00> : vector<128xf32>
    %82 = vector.multi_reduction <add>, %81, %cst_42 [1] : vector<128x32xf32> to vector<128xf32>
    %83 = vector.shape_cast %82 : vector<128xf32> to vector<128x1xf32>
    %cst_43 = arith.constant 3.200000e+01 : f32
    %84 = vector.broadcast %cst_43 : f32 to vector<128x1xf32>
    %85 = arith.divf %83, %84 : vector<128x1xf32>
    %86 = vector.broadcast %85 : vector<128x1xf32> to vector<128x32xf32>
    %87 = arith.subf %81, %86 : vector<128x32xf32>
    %88 = vector.broadcast %85 : vector<128x1xf32> to vector<128x32xf32>
    %89 = arith.subf %81, %88 : vector<128x32xf32>
    %90 = arith.mulf %87, %89 : vector<128x32xf32>
    %cst_44 = arith.constant dense<0.000000e+00> : vector<128xf32>
    %91 = vector.multi_reduction <add>, %90, %cst_44 [1] : vector<128x32xf32> to vector<128xf32>
    %92 = vector.shape_cast %91 : vector<128xf32> to vector<128x1xf32>
    %cst_45 = arith.constant 3.200000e+01 : f32
    %93 = vector.broadcast %cst_45 : f32 to vector<128x1xf32>
    %94 = arith.divf %92, %93 : vector<128x1xf32>
    %95 = vector.broadcast %85 : vector<128x1xf32> to vector<128x32xf32>
    %96 = arith.subf %81, %95 : vector<128x32xf32>
    %cst_46 = arith.constant 9.99999974E-6 : f32
    %97 = vector.broadcast %cst_46 : f32 to vector<128x1xf32>
    %98 = arith.addf %94, %97 : vector<128x1xf32>
    %99 = math.rsqrt %98 : vector<128x1xf32>
    %100 = vector.broadcast %99 : vector<128x1xf32> to vector<128x32xf32>
    %101 = arith.mulf %96, %100 : vector<128x32xf32>
    %102 = vector.broadcast %5 : vector<1x32xf32> to vector<128x32xf32>
    %103 = arith.mulf %101, %102 : vector<128x32xf32>
    %104 = vector.broadcast %6 : vector<1x32xf32> to vector<128x32xf32>
    %105 = arith.addf %103, %104 : vector<128x32xf32>
    %c0_47 = arith.constant 0 : index
    %c0_48 = arith.constant 0 : index
    %c0_49 = arith.constant 0 : index
    %106 = vector.load %arg11[%c0_47, %c0_48, %c0_49] : memref<1x128x32xf32, #tpu.memory_space<vmem>>, vector<1x128x32xf32>
    %107 = vector.shape_cast %106 : vector<1x128x32xf32> to vector<128x32xf32>
    %108 = vector.shape_cast %105 : vector<128x32xf32> to vector<1x128x32xf32>
    tpu.vector_store %arg11[%c0_47, %c0_48, %c0_49], %108 {strides = array<i32>} : memref<1x128x32xf32, #tpu.memory_space<vmem>>, vector<1x128x32xf32>,
    return
  }
  func.func @transform_0(%arg0: i32) -> (i32, i32, i32) {
    %c0_i32 = arith.constant 0 : i32
    %c0_i32_0 = arith.constant 0 : i32
    %c0_i32_1 = arith.constant 0 : i32
    return %arg0, %c0_i32, %c0_i32_0 : i32, i32, i32
  }
  func.func @transform_1(%arg0: i32) -> (i32, i32) {
    %c0_i32 = arith.constant 0 : i32
    %c0_i32_0 = arith.constant 0 : i32
    %c0_i32_1 = arith.constant 0 : i32
    return %c0_i32, %c0_i32_0 : i32, i32
  }
  func.func @transform_2(%arg0: i32) -> (i32, i32) {
    %c0_i32 = arith.constant 0 : i32
    %c0_i32_0 = arith.constant 0 : i32
    %c0_i32_1 = arith.constant 0 : i32
    return %c0_i32, %c0_i32_0 : i32, i32
  }
  func.func @transform_3(%arg0: i32) -> (i32, i32) {
    %c0_i32 = arith.constant 0 : i32
    %c0_i32_0 = arith.constant 0 : i32
    %c0_i32_1 = arith.constant 0 : i32
    return %c0_i32, %c0_i32_0 : i32, i32
  }
  func.func @transform_4(%arg0: i32) -> (i32, i32) {
    %c0_i32 = arith.constant 0 : i32
    %c0_i32_0 = arith.constant 0 : i32
    %c0_i32_1 = arith.constant 0 : i32
    return %c0_i32, %c0_i32_0 : i32, i32
  }
  func.func @transform_5(%arg0: i32) -> (i32, i32) {
    %c0_i32 = arith.constant 0 : i32
    %c0_i32_0 = arith.constant 0 : i32
    %c0_i32_1 = arith.constant 0 : i32
    return %c0_i32, %c0_i32_0 : i32, i32
  }
  func.func @transform_6(%arg0: i32) -> (i32, i32) {
    %c0_i32 = arith.constant 0 : i32
    %c0_i32_0 = arith.constant 0 : i32
    %c0_i32_1 = arith.constant 0 : i32
    return %c0_i32, %c0_i32_0 : i32, i32
  }
  func.func @transform_7(%arg0: i32) -> (i32, i32) {
    %c0_i32 = arith.constant 0 : i32
    %c0_i32_0 = arith.constant 0 : i32
    %c0_i32_1 = arith.constant 0 : i32
    return %c0_i32, %c0_i32_0 : i32, i32
  }
  func.func @transform_8(%arg0: i32) -> (i32, i32) {
    %c0_i32 = arith.constant 0 : i32
    %c0_i32_0 = arith.constant 0 : i32
    %c0_i32_1 = arith.constant 0 : i32
    return %c0_i32, %c0_i32_0 : i32, i32
  }
  func.func @transform_9(%arg0: i32) -> (i32, i32) {
    %c0_i32 = arith.constant 0 : i32
    %c0_i32_0 = arith.constant 0 : i32
    %c0_i32_1 = arith.constant 0 : i32
    return %c0_i32, %c0_i32_0 : i32, i32
  }
  func.func @transform_10(%arg0: i32) -> (i32, i32, i32) {
    %c0_i32 = arith.constant 0 : i32
    %c0_i32_0 = arith.constant 0 : i32
    %c0_i32_1 = arith.constant 0 : i32
    return %arg0, %c0_i32, %c0_i32_0 : i32, i32, i32
  }
}

</mosaic_0001>

<bundles_post_ra>
// kernel: _lambda_.1
= control target key start
LH: loop header
LB: loop body
LE: loop exit
PB: predicated region body
PF: predicated region fallthrough
CT: control target
= control target key end

     0   :  { %s5829_s13 = smov 0   ;;  %s7206_s0 = inlined_call_operand.vmem [shape: f32[2,128,4], index: 0, kind: input, shape index: {}]   ;;  %s7207_s1 = inlined_call_operand.vmem [shape: f32[128,128], index: 1, kind: input, shape index: {}]   ;;  %s7208_s2 = inlined_call_operand.vmem [shape: f32[4,32], index: 2, kind: input, shape index: {}]   ;;  %s7209_s3 = inlined_call_operand.vmem [shape: f32[32,96], index: 3, kind: input, shape index: {}]   ;;  %s7210_s4 = inlined_call_operand.vmem [shape: f32[1,96], index: 4, kind: input, shape index: {}]   ;;  %s7211_s5 = inlined_call_operand.vmem [shape: f32[32,32], index: 5, kind: input, shape index: {}]   ;;  %s7212_s6 = inlined_call_operand.vmem [shape: f32[32,64], index: 6, kind: input, shape index: {}]   ;;  %s7213_s7 = inlined_call_operand.vmem [shape: f32[1,64], index: 7, kind: input, shape index: {}]   ;;  %s7214_s8 = inlined_call_operand.vmem [shape: f32[64,32], index: 8, kind: input, shape index: {}]   ;;  %s7215_s9 = inlined_call_operand.vmem [shape: f32[7,32], index: 9, kind: input, shape index: {}]   ;;  %s7216_s10 = inlined_call_operand.vmem [shape: f32[2,128,32], index: 10, kind: output, shape index: {}]  }
   0x1 LB: > { %s4820_s14 = sadd.s32 4294967295, %s5768_s13   ;;  %p4824_p0 = scmp.ge.s32.totalorder %s5768_s13, 1  ;;  %s5768_s13 = sphi %s5829_s13, %s20_s13  }
   0x2   : > { %p312_p1 = scmp.lt.s32.totalorder %s5768_s13, 3 }
   0x4   : > { %p313_p2 = pnand %p4824_p0, %p312_p1 }
   0x5   : > { %v383_v0 = vld [vmem:[%s7208_s2] sm:$0xf] (!%p313_p2)  ;;  %vm437_vm0 = vcmask (!%p313_p2), 1043456   ;;  %p350_p3 = scmp.lt.s32.totalorder (!%p313_p2), %s4820_s14, 1  ;;  %vm388_vm1 = vcmask (!%p313_p2), 31744   ;;  %v764_v19 = vld [vmem:[%s7209_s3 + $0x8] sm:$0xff] (!%p313_p2) }
   0x6   : > { %316 = sbr.rel (%p313_p2) target bundleno = 2912 (0xb60), region = 60  ;;  %5168 = vmatprep.subr.msk.mxu0 (!%p313_p2), %vm437_vm0, %v383_v0  ;;  %v586_v17 = vld [vmem:[%s7207_s1] sm:$0xff] (!%p313_p2)  ;;  %v587_v62 = vld [vmem:[%s7207_s1 + $0x8] sm:$0xff] (!%p313_p2)  ;;  %v588_v63 = vld [vmem:[%s7207_s1 + $0x10] sm:$0xff] (!%p313_p2)  ;;  %vm774_vm2 = vcmask (!%p313_p2), 261120   ;;  %vm5771_vm3 = vmmov (!%p313_p2), 0  }
   0x7   : > { %5169 = vmatpush3.msk.msra.mxu0 (!%p313_p2), %vm437_vm0, %v383_v0  ;;  %5226 = vmatprep.mubr.f32.mxu1 (!%p313_p2), %v586_v17  ;;  %v763_v18 = vld [vmem:[%s7209_s3] sm:$0xff] (!%p313_p2)  ;;  %v589_v0 = vld [vmem:[%s7207_s1 + $0x18] sm:$0xff] (!%p313_p2)  ;;  %s5772_s11 = smov (!%p313_p2), 96   ;;  %s5773_s12 = smov (!%p313_p2), 64   ;;  %vm2200_vm4 = vcmask (!%p313_p2), 64512   ;;  %vm4291_vm5 = vcmask (!%p313_p2), 523264  }
   0x8   : > { %v5578_v20 = vpack.c.bf16 (!%p313_p2), %v764_v19, %v763_v18  ;;  %v4829_v21 = vld [vmem:[%s7215_s9] ss:$0 sm:$0xff] (!%p313_p2) }
   0xa   : > { %5579 = vmatprep.subr.bf16.mxu0 (!%p313_p2), %v5578_v20 }
   0xd   : > { %s7236_s14 = smov (!%p350_p3, %s4820_s14), 1 }
   0xe   : > { %s4969_s17 = sshll.u32 %s7236_s14, 7 }
   0xf   : > { %s5848_s20 = scalar_lea.vmem %s7206_s0, %s4969_s17  ;;  %s7124_s30 = scalar_lea.vmem %s7216_s10, %s4969_s17 }
  0x10   : > { %v367_v1 = vld [vmem:[%s5848_s20] sm:$0xff]  ;;  %v368_v2 = vld [vmem:[%s5848_s20 + $0x8] sm:$0xff]  ;;  %v369_v3 = vld [vmem:[%s5848_s20 + $0x10] sm:$0xff] }
  0x11   : > { %5170 = vmatprep.mubr.msk.f32.mxu0 %vm388_vm1, %v367_v1  ;;  %v370_v4 = vld [vmem:[%s5848_s20 + $0x18] sm:$0xff]  ;;  %v371_v5 = vld [vmem:[%s5848_s20 + $0x20] sm:$0xff]  ;;  %v372_v6 = vld [vmem:[%s5848_s20 + $0x28] sm:$0xff] }
  0x12   : > { %5171 = vmatmul.mubr.msk.f32.vlgmr.msra.gmra.mrb[0].mxu0 %vm388_vm1, %v368_v2  ;;  %v373_v7 = vld [vmem:[%s5848_s20 + $0x30] sm:$0xff]  ;;  %v374_v8 = vld [vmem:[%s5848_s20 + $0x38] sm:$0xff]  ;;  %v375_v9 = vld [vmem:[%s5848_s20 + $0x40] sm:$0xff] }
  0x13   : > { %5173 = vmatprep.mubr.msk.f32.mxu0 %vm388_vm1, %v369_v3  ;;  %v376_v10 = vld [vmem:[%s5848_s20 + $0x48] sm:$0xff]  ;;  %v377_v11 = vld [vmem:[%s5848_s20 + $0x50] sm:$0xff]  ;;  %v378_v12 = vld [vmem:[%s5848_s20 + $0x58] sm:$0xff]  ;;  %5581 = vmatpush3.bf16.msra.mxu0 %v5578_v20 }
  0x14   : > { %v379_v13 = vld [vmem:[%s5848_s20 + $0x60] sm:$0xff]  ;;  %v380_v14 = vld [vmem:[%s5848_s20 + $0x68] sm:$0xff]  ;;  %v381_v15 = vld [vmem:[%s5848_s20 + $0x70] sm:$0xff] }
  0x15   : > { %v382_v16 = vld [vmem:[%s5848_s20 + $0x78] sm:$0xff]  ;;  %v590_v1 = vld [vmem:[%s7207_s1 + $0x20] sm:$0xff]  ;;  %v591_v2 = vld [vmem:[%s7207_s1 + $0x28] sm:$0xff] }
  0x16   : > { %5174 = vmatmul.mubr.msk.f32.gmra.mrb[2].mxu0 %vm388_vm1, %v370_v4  ;;  %v592_v3 = vld [vmem:[%s7207_s1 + $0x30] sm:$0xff]  ;;  %v593_v4 = vld [vmem:[%s7207_s1 + $0x38] sm:$0xff] }
  0x17   : > { %5176 = vmatprep.mubr.msk.f32.mxu0 %vm388_vm1, %v371_v5  ;;  %v594_v5 = vld [vmem:[%s7207_s1 + $0x40] sm:$0xff] }
  0x1a   : > { %5177 = vmatmul.mubr.msk.f32.gmra.mrb[4].mxu0 %vm388_vm1, %v372_v6  ;;  %v595_v6 = vld [vmem:[%s7207_s1 + $0x48] sm:$0xff] }
  0x1b   : > { %5179 = vmatprep.mubr.msk.f32.mxu0 %vm388_vm1, %v373_v7  ;;  %v596_v7 = vld [vmem:[%s7207_s1 + $0x50] sm:$0xff] }
  0x1e   : > { %5180 = vmatmul.mubr.msk.f32.gmra.mrb[6].mxu0 %vm388_vm1, %v374_v8  ;;  %v597_v8 = vld [vmem:[%s7207_s1 + $0x58] sm:$0xff] }
  0x1f   : > { %5182 = vmatprep.mubr.msk.f32.mxu0 %vm388_vm1, %v375_v9  ;;  %v598_v9 = vld [vmem:[%s7207_s1 + $0x60] sm:$0xff] }
  0x22   : > { %5183 = vmatmul.mubr.msk.f32.gmra.mrb[8].mxu0 %vm388_vm1, %v376_v10  ;;  %v599_v10 = vld [vmem:[%s7207_s1 + $0x68] sm:$0xff] }
  0x23   : > { %5185 = vmatprep.mubr.msk.f32.mxu0 %vm388_vm1, %v377_v11  ;;  %v600_v11 = vld [vmem:[%s7207_s1 + $0x70] sm:$0xff] }
  0x26   : > { %5186 = vmatmul.mubr.msk.f32.gmra.mrb[10].mxu0 %vm388_vm1, %v378_v12  ;;  %v601_v12 = vld [vmem:[%s7207_s1 + $0x78] sm:$0xff] }
  0x27   : > { %5188 = vmatprep.mubr.msk.f32.mxu0 %vm388_vm1, %v379_v13  ;;  %v765_v13 = vld [vmem:[%s7209_s3 + $0x10] sm:$0xff] }
  0x2a   : > { %5189 = vmatmul.mubr.msk.f32.gmra.mrb[12].mxu0 %vm388_vm1, %v380_v14  ;;  %v766_v14 = vld [vmem:[%s7209_s3 + $0x18] sm:$0xff] }
  0x2b   : > { %5191 = vmatprep.mubr.msk.f32.mxu0 %vm388_vm1, %v381_v15  ;;  %v5582_v15 = vpack.c.bf16 %v766_v14, %v765_v13 }
  0x2d   : > { %5583 = vmatprep.subr.bf16.mxu0 %v5582_v15 }
  0x2e   : > { %5192 = vmatmul.mubr.msk.f32.gmra.mrb[14].mxu0 %vm388_vm1, %v382_v16 }
  0x2f   : > { %5585 = vmatpush3.bf16.msra.mxu0 %v5582_v15 }
  0xe5   : > { %v5172_v22 = vpop.f32.mrb[0].mxu0 }
  0xe6   : > { %v513_v23 = vadd.f32 %v5172_v22, %v4829_v21  ;;  %v507_v24 = vpop.f32.mrb[1].mxu0 }
  0xe7   : > { %v508_v25 = vadd.f32 %v4829_v21, %v507_v24 }
  0xe9   : > { %v5175_v26 = vpop.f32.mrb[2].mxu0  ;;  %v5546_v27 = vpack.c.bf16 %v513_v23, %v508_v25 }
  0xea   : > { %v523_v28 = vadd.f32 %v5175_v26, %v4829_v21  ;;  %v517_v29 = vpop.f32.mrb[3].mxu0 }
  0xeb   : > { %v518_v30 = vadd.f32 %v4829_v21, %v517_v29  ;;  %5547 = vmatprep.subr.bf16.mxu1 %v5546_v27 }
  0xec   : > { %5549 = vmatpush3.bf16.msra.mxu1 %v5546_v27 }
  0xed   : > { %v5550_v31 = vpack.c.bf16 %v523_v28, %v518_v30  ;;  %v5178_v32 = vpop.f32.mrb[4].mxu0 }
  0xee   : > { %v533_v33 = vadd.f32 %v5178_v32, %v4829_v21  ;;  %v527_v34 = vpop.f32.mrb[5].mxu0 }
  0xef   : > { %v528_v35 = vadd.f32 %v4829_v21, %v527_v34  ;;  %5551 = vmatprep.subr.bf16.mxu1 %v5550_v31 }
  0xf0   : > { %5553 = vmatpush3.bf16.msra.mxu1 %v5550_v31 }
  0xf1   : > { %v5554_v36 = vpack.c.bf16 %v533_v33, %v528_v35  ;;  %v5181_v37 = vpop.f32.mrb[6].mxu0 }
  0xf2   : > { %v543_v38 = vadd.f32 %v5181_v37, %v4829_v21  ;;  %v537_v39 = vpop.f32.mrb[7].mxu0 }
  0xf3   : > { %v538_v40 = vadd.f32 %v4829_v21, %v537_v39  ;;  %5555 = vmatprep.subr.bf16.mxu1 %v5554_v36 }
  0xf4   : > { %5557 = vmatpush3.bf16.msra.mxu1 %v5554_v36 }
  0xf5   : > { %v5558_v41 = vpack.c.bf16 %v543_v38, %v538_v40  ;;  %v5184_v42 = vpop.f32.mrb[8].mxu0 }
  0xf6   : > { %v553_v43 = vadd.f32 %v5184_v42, %v4829_v21  ;;  %v547_v44 = vpop.f32.mrb[9].mxu0 }
  0xf7   : > { %v548_v45 = vadd.f32 %v4829_v21, %v547_v44  ;;  %5559 = vmatprep.subr.bf16.mxu1 %v5558_v41 }
  0xf8   : > { %5561 = vmatpush3.bf16.msra.mxu1 %v5558_v41 }
  0xf9   : > { %v5562_v46 = vpack.c.bf16 %v553_v43, %v548_v45  ;;  %v5187_v47 = vpop.f32.mrb[10].mxu0 }
  0xfa   : > { %v563_v48 = vadd.f32 %v5187_v47, %v4829_v21  ;;  %v557_v49 = vpop.f32.mrb[11].mxu0 }
  0xfb   : > { %v558_v50 = vadd.f32 %v4829_v21, %v557_v49  ;;  %5563 = vmatprep.subr.bf16.mxu1 %v5562_v46  ;;  %v4847_v49 = vld [vmem:[%s7210_s4] ss:$0 sm:$0xff] }
  0xfc   : > { %5565 = vmatpush3.bf16.msra.mxu1 %v5562_v46 }
  0xfd   : > { %v5566_v51 = vpack.c.bf16 %v563_v48, %v558_v50  ;;  %v5190_v52 = vpop.f32.mrb[12].mxu0  ;;  %v5770_v48 = vmov 0.0  }
  0xfe   : > { %v573_v53 = vadd.f32 %v5190_v52, %v4829_v21  ;;  %v567_v54 = vpop.f32.mrb[13].mxu0  ;;  %5287 = vmatprep.subr.mxu0 %v5770_v48 }
  0xff   : > { %v568_v55 = vadd.f32 %v4829_v21, %v567_v54  ;;  %5567 = vmatprep.subr.bf16.mxu1 %v5566_v51 }
 0x100   : > { %5569 = vmatpush3.bf16.msra.mxu1 %v5566_v51 }
 0x101   : > { %v5570_v56 = vpack.c.bf16 %v573_v53, %v568_v55  ;;  %v5193_v57 = vpop.f32.mrb[14].mxu0 }
 0x102   : > { %v583_v58 = vadd.f32 %v5193_v57, %v4829_v21  ;;  %v577_v59 = vpop.f32.mrb[15].mxu0 }
 0x103   : > { %v578_v60 = vadd.f32 %v4829_v21, %v577_v59  ;;  %5571 = vmatprep.subr.bf16.mxu1 %v5570_v56 }
 0x104   : > { %5573 = vmatpush3.bf16.msra.mxu1 %v5570_v56 }
 0x105   : > { %v5574_v61 = vpack.c.bf16 %v583_v58, %v578_v60 }
 0x107   : > { %5575 = vmatprep.subr.bf16.mxu1 %v5574_v61 }
 0x108   : > { %5577 = vmatpush3.bf16.msra.mxu1 %v5574_v61 }
 0x109   : > { %5282 = vmatprep.subr.mxu1 %v5770_v48 }
 0x10b   : > { %5227 = vmatmul.mubr.f32.vlgmr.msra.gmra.mrb[0].mxu1 %v587_v62 }
 0x10c   : > { %5229 = vmatprep.mubr.f32.mxu1 %v588_v63 }
 0x10f   : > { %5230 = vmatmul.mubr.f32.gmra.mrb[2].mxu1 %v589_v0 }
 0x110   : > { %5232 = vmatprep.mubr.f32.mxu1 %v590_v1 }
 0x113   : > { %5233 = vmatmul.mubr.f32.gmra.mrb[4].mxu1 %v591_v2 }
 0x114   : > { %5235 = vmatprep.mubr.f32.mxu1 %v592_v3 }
 0x117   : > { %5236 = vmatmul.mubr.f32.gmra.mrb[6].mxu1 %v593_v4 }
 0x118   : > { %5238 = vmatprep.mubr.f32.mxu1 %v594_v5 }
 0x11b   : > { %5239 = vmatmul.mubr.f32.gmra.mrb[8].mxu1 %v595_v6 }
 0x11c   : > { %5241 = vmatprep.mubr.f32.mxu1 %v596_v7 }
 0x11f   : > { %5242 = vmatmul.mubr.f32.gmra.mrb[10].mxu1 %v597_v8 }
 0x120   : > { %5244 = vmatprep.mubr.f32.mxu1 %v598_v9 }
 0x123   : > { %5245 = vmatmul.mubr.f32.gmra.mrb[12].mxu1 %v599_v10 }
 0x124   : > { %5247 = vmatprep.mubr.f32.mxu1 %v600_v11 }
 0x127   : > { %5248 = vmatmul.mubr.f32.gmra.mrb[14].mxu1 %v601_v12 }
 0x128   : > { %5284 = vmatprep.mubr.msk.f32.mxu1 %vm5771_vm3, %v5770_v48 }
 0x1de   : > { %v5945_v16 = vpop.f32.mrb[0].mxu1 }
 0x1df   : > { %v5947_v17 = vpop.f32.mrb[1].mxu1  ;;  %v748_v19 = vmax.f32 %v5945_v16, 0.0 }
 0x1e0   : > { %v747_v18 = vmax.f32 %v5947_v17, 0.0 }
 0x1e2   : > { %v5951_v20 = vpop.f32.mrb[2].mxu1  ;;  %5258 = vmatprep.mubr.msk.f32.mxu0 %vm774_vm2, %v747_v18 }
 0x1e3   : > { %v5956_v21 = vpop.f32.mrb[3].mxu1  ;;  %5259 = vmatmul.mubr.msk.f32.vlgmr.msra.gmra.mrb[16].mxu0 %vm774_vm2, %v748_v19  ;;  %v750_v23 = vmax.f32 %v5951_v20, 0.0 }
 0x1e4   : > { %v749_v22 = vmax.f32 %v5956_v21, 0.0 }
 0x1e6   : > { %v5963_v24 = vpop.f32.mrb[4].mxu1  ;;  %5261 = vmatprep.mubr.msk.f32.mxu0 %vm774_vm2, %v749_v22 }
 0x1e7   : > { %v5968_v25 = vpop.f32.mrb[5].mxu1  ;;  %5262 = vmatmul.mubr.msk.f32.gmra.mrb[18].mxu0 %vm774_vm2, %v750_v23  ;;  %v752_v27 = vmax.f32 %v5963_v24, 0.0 }
 0x1e8   : > { %v751_v26 = vmax.f32 %v5968_v25, 0.0 }
 0x1ea   : > { %v5975_v28 = vpop.f32.mrb[6].mxu1  ;;  %5264 = vmatprep.mubr.msk.f32.mxu0 %vm774_vm2, %v751_v26 }
 0x1eb   : > { %v5980_v29 = vpop.f32.mrb[7].mxu1  ;;  %5265 = vmatmul.mubr.msk.f32.gmra.mrb[20].mxu0 %vm774_vm2, %v752_v27  ;;  %v7225_v31 = vmax.f32 %v5975_v28, 0.0 }
 0x1ec   : > { %v753_v30 = vmax.f32 %v5980_v29, 0.0 }
 0x1ee   : > { %v5987_v32 = vpop.f32.mrb[8].mxu1  ;;  %5267 = vmatprep.mubr.msk.f32.mxu0 %vm774_vm2, %v753_v30 }
 0x1ef   : > { %v5992_v33 = vpop.f32.mrb[9].mxu1  ;;  %5268 = vmatmul.mubr.msk.f32.gmra.mrb[22].mxu0 %vm774_vm2, %v7225_v31  ;;  %v7223_v35 = vmax.f32 %v5987_v32, 0.0 }
 0x1f0   : > { %v7224_v34 = vmax.f32 %v5992_v33, 0.0 }
 0x1f2   : > { %v5999_v36 = vpop.f32.mrb[10].mxu1  ;;  %5270 = vmatprep.mubr.msk.f32.mxu0 %vm774_vm2, %v7224_v34 }
 0x1f3   : > { %v6004_v37 = vpop.f32.mrb[11].mxu1  ;;  %5271 = vmatmul.mubr.msk.f32.gmra.mrb[24].mxu0 %vm774_vm2, %v7223_v35  ;;  %v7221_v39 = vmax.f32 %v5999_v36, 0.0 }
 0x1f4   : > { %v7222_v38 = vmax.f32 %v6004_v37, 0.0 }
 0x1f6   : > { %v6011_v40 = vpop.f32.mrb[12].mxu1  ;;  %5273 = vmatprep.mubr.msk.f32.mxu0 %vm774_vm2, %v7222_v38 }
 0x1f7   : > { %v6016_v41 = vpop.f32.mrb[13].mxu1  ;;  %5274 = vmatmul.mubr.msk.f32.gmra.mrb[26].mxu0 %vm774_vm2, %v7221_v39  ;;  %v7219_v43 = vmax.f32 %v6011_v40, 0.0 }
 0x1f8   : > { %v7220_v42 = vmax.f32 %v6016_v41, 0.0 }
 0x1fa   : > { %v6023_v44 = vpop.f32.mrb[14].mxu1  ;;  %5276 = vmatprep.mubr.msk.f32.mxu0 %vm774_vm2, %v7220_v42 }
 0x1fb   : > { %v7218_v45 = vmax.f32 %v6023_v44, 0.0  ;;  %v6029_v46 = vpop.f32.mrb[15].mxu1  ;;  %5277 = vmatmul.mubr.msk.f32.gmra.mrb[28].mxu0 %vm774_vm2, %v7219_v43 }
 0x1fc   : > { %v7217_v47 = vmax.f32 %v6029_v46, 0.0 }
 0x1fe   : > { %5279 = vmatprep.mubr.msk.f32.mxu0 %vm774_vm2, %v7217_v47 }
 0x1ff   : > { %5280 = vmatmul.mubr.msk.f32.gmra.mrb[30].mxu0 %vm774_vm2, %v7218_v45 }
 0x200   : > { %5289 = vmatprep.mubr.msk.f32.mxu0 %vm5771_vm3, %v5770_v48 }
 0x2b6   : > { %v5260_v50 = vpop.f32.mrb[16].mxu0 }
 0x2b7   : > { %v889_v51 = vpop.f32.mrb[17].mxu0  ;;  %v6051_v55 = vadd.f32 %v5260_v50, %v4847_v49 }
 0x2b8   : > { %v890_v52 = vadd.f32 %v4847_v49, %v889_v51 }
 0x2ba   : > { %969 = vrot.lane.b32.xlu0 %v890_v52, %s5772_s11  ;;  %v5263_v53 = vpop.f32.mrb[18].mxu0 }
 0x2bb   : > { %v899_v54 = vpop.f32.mrb[19].mxu0  ;;  %v6059_v59 = vadd.f32 %v5263_v53, %v4847_v49 }
 0x2bc   : > { %v6053_v56 = vadd.f32 %v4847_v49, %v899_v54 }
 0x2be   : > { %1046 = vrot.lane.b32.xlu0 %v6051_v55, %s5772_s11  ;;  %1123 = vrot.lane.b32.xlu1 %v6053_v56, %s5772_s11  ;;  %v5266_v57 = vpop.f32.mrb[20].mxu0 }
 0x2bf   : > { %v909_v58 = vpop.f32.mrb[21].mxu0  ;;  %v6067_v63 = vadd.f32 %v5266_v57, %v4847_v49 }
 0x2c0   : > { %v6061_v60 = vadd.f32 %v4847_v49, %v909_v58 }
 0x2c2   : > { %1200 = vrot.lane.b32.xlu1 %v6059_v59, %s5772_s11  ;;  %1277 = vrot.lane.b32.xlu0 %v6061_v60, %s5772_s11  ;;  %v5269_v61 = vpop.f32.mrb[22].mxu0 }
 0x2c3   : > { %v919_v62 = vpop.f32.mrb[23].mxu0  ;;  %v6075_v3 = vadd.f32 %v5269_v61, %v4847_v49 }
 0x2c4   : > { %v6069_v0 = vadd.f32 %v4847_v49, %v919_v62 }
 0x2c6   : > { %1354 = vrot.lane.b32.xlu1 %v6067_v63, %s5772_s11  ;;  %1431 = vrot.lane.b32.xlu0 %v6069_v0, %s5772_s11  ;;  %v5272_v1 = vpop.f32.mrb[24].mxu0 }
 0x2c7   : > { %v929_v2 = vpop.f32.mrb[25].mxu0  ;;  %v6083_v7 = vadd.f32 %v5272_v1, %v4847_v49 }
 0x2c8   : > { %v6077_v4 = vadd.f32 %v4847_v49, %v929_v2 }
 0x2ca   : > { %1508 = vrot.lane.b32.xlu1 %v6075_v3, %s5772_s11  ;;  %1585 = vrot.lane.b32.xlu0 %v6077_v4, %s5772_s11  ;;  %v5275_v5 = vpop.f32.mrb[26].mxu0 }
 0x2cb   : > { %v939_v6 = vpop.f32.mrb[27].mxu0  ;;  %v6091_v11 = vadd.f32 %v5275_v5, %v4847_v49 }
 0x2cc   : > { %v6085_v8 = vadd.f32 %v4847_v49, %v939_v6 }
 0x2ce   : > { %1662 = vrot.lane.b32.xlu1 %v6083_v7, %s5772_s11  ;;  %1739 = vrot.lane.b32.xlu0 %v6085_v8, %s5772_s11  ;;  %v5278_v9 = vpop.f32.mrb[28].mxu0 }
 0x2cf   : > { %v949_v10 = vpop.f32.mrb[29].mxu0  ;;  %v6099_v15 = vadd.f32 %v5278_v9, %v4847_v49 }
 0x2d0   : > { %v6093_v12 = vadd.f32 %v4847_v49, %v949_v10 }
 0x2d2   : > { %1816 = vrot.lane.b32.xlu1 %v6091_v11, %s5772_s11  ;;  %1893 = vrot.lane.b32.xlu0 %v6093_v12, %s5772_s11  ;;  %v5281_v13 = vpop.f32.mrb[30].mxu0 }
 0x2d3   : > { %v959_v14 = vpop.f32.mrb[31].mxu0  ;;  %v6103_v51 = vadd.f32 %v5281_v13, %v4847_v49 }
 0x2d4   : > { %v6101_v50 = vadd.f32 %v4847_v49, %v959_v14 }
 0x2d6   : > { %1970 = vrot.lane.b32.xlu1 %v6099_v15, %s5772_s11  ;;  %2047 = vrot.lane.b32.xlu0 %v6101_v50, %s5772_s11 }
 0x2da   : > { %2124 = vrot.lane.b32.xlu1 %v6103_v51, %s5772_s11  ;;  %2453 = vrot.lane.b32.xlu0 %v6051_v55, %s5773_s12 }
 0x2de   : > { %2377 = vrot.lane.b32.xlu1 %v890_v52, %s5773_s12  ;;  %2605 = vrot.lane.b32.xlu0 %v6059_v59, %s5773_s12 }
 0x2e2   : > { %2529 = vrot.lane.b32.xlu1 %v6053_v56, %s5773_s12  ;;  %2833 = vrot.lane.b32.xlu0 %v6069_v0, %s5773_s12 }
 0x2e6   : > { %2681 = vrot.lane.b32.xlu1 %v6061_v60, %s5773_s12  ;;  %2985 = vrot.lane.b32.xlu0 %v6077_v4, %s5773_s12 }
 0x2ea   : > { %2757 = vrot.lane.b32.xlu1 %v6067_v63, %s5773_s12 }
 0x2ee   : > { %2909 = vrot.lane.b32.xlu1 %v6075_v3, %s5773_s12 }
 0x2f2   : > { %3061 = vrot.lane.b32.xlu1 %v6083_v7, %s5773_s12 }
 0x32c   : > { %v970_v49 = vpop.permute.xlu0 %969 }
 0x32d   : > { %5283 = vmatpush3.xpose.msk.msra.mxu1 %vm774_vm2, %v970_v49 }
 0x32e   : > { %5292 = vmatprep.subr.mxu1 %v5770_v48 }
 0x330   : > { %5285 = vmatmul.mubr.msk.f32.vlgmr.msra.gmra.mrb[16].mxu1 %vm774_vm2, %v890_v52  ;;  %v1047_v53 = vpop.permute.xlu0 %1046  ;;  %v1124_v54 = vpop.permute.xlu1 %1123 }
 0x331   : > { %5288 = vmatpush3.xpose.msk.msra.mxu0 %vm774_vm2, %v1047_v53  ;;  %5293 = vmatpush3.xpose.msk.msra.mxu1 %vm774_vm2, %v1124_v54 }
 0x332   : > { %5294 = vmatprep.mubr.msk.f32.mxu1 %vm5771_vm3, %v5770_v48  ;;  %5297 = vmatprep.subr.mxu0 %v5770_v48 }
 0x333   : > { %5302 = vmatprep.subr.mxu1 %v5770_v48 }
 0x334   : > { %5295 = vmatmul.mubr.msk.f32.vlgmr.msra.gmra.mrb[18].mxu1 %vm774_vm2, %v6053_v56  ;;  %v1201_v57 = vpop.permute.xlu1 %1200  ;;  %v1278_v58 = vpop.permute.xlu0 %1277  ;;  %5290 = vmatmul.mubr.msk.f32.vlgmr.msra.gmra.mrb[32].mxu0 %vm774_vm2, %v6051_v55 }
 0x335   : > { %5298 = vmatpush3.xpose.msk.msra.mxu0 %vm774_vm2, %v1201_v57  ;;  %5303 = vmatpush3.xpose.msk.msra.mxu1 %vm774_vm2, %v1278_v58 }
 0x336   : > { %5299 = vmatprep.mubr.msk.f32.mxu0 %vm5771_vm3, %v5770_v48  ;;  %5304 = vmatprep.mubr.msk.f32.mxu1 %vm5771_vm3, %v5770_v48 }
 0x337   : > { %5312 = vmatprep.subr.mxu1 %v5770_v48  ;;  %5307 = vmatprep.subr.mxu0 %v5770_v48 }
 0x338   : > { %v1355_v52 = vpop.permute.xlu1 %1354  ;;  %5305 = vmatmul.mubr.msk.f32.vlgmr.msra.gmra.mrb[20].mxu1 %vm774_vm2, %v6061_v60  ;;  %v1432_v56 = vpop.permute.xlu0 %1431  ;;  %5300 = vmatmul.mubr.msk.f32.vlgmr.msra.gmra.mrb[34].mxu0 %vm774_vm2, %v6059_v59 }
 0x339   : > { %5308 = vmatpush3.xpose.msk.msra.mxu0 %vm774_vm2, %v1355_v52  ;;  %5313 = vmatpush3.xpose.msk.msra.mxu1 %vm774_vm2, %v1432_v56 }
 0x33a   : > { %5309 = vmatprep.mubr.msk.f32.mxu0 %vm5771_vm3, %v5770_v48  ;;  %5314 = vmatprep.mubr.msk.f32.mxu1 %vm5771_vm3, %v5770_v48 }
 0x33b   : > { %5322 = vmatprep.subr.mxu1 %v5770_v48  ;;  %5317 = vmatprep.subr.mxu0 %v5770_v48 }
 0x33c   : > { %v1509_v55 = vpop.permute.xlu1 %1508  ;;  %5315 = vmatmul.mubr.msk.f32.vlgmr.msra.gmra.mrb[22].mxu1 %vm774_vm2, %v6069_v0  ;;  %v1586_v60 = vpop.permute.xlu0 %1585  ;;  %5310 = vmatmul.mubr.msk.f32.vlgmr.msra.gmra.mrb[36].mxu0 %vm774_vm2, %v6067_v63 }
 0x33d   : > { %5318 = vmatpush3.xpose.msk.msra.mxu0 %vm774_vm2, %v1509_v55  ;;  %5323 = vmatpush3.xpose.msk.msra.mxu1 %vm774_vm2, %v1586_v60 }
 0x33e   : > { %5319 = vmatprep.mubr.msk.f32.mxu0 %vm5771_vm3, %v5770_v48  ;;  %5324 = vmatprep.mubr.msk.f32.mxu1 %vm5771_vm3, %v5770_v48 }
 0x33f   : > { %5332 = vmatprep.subr.mxu1 %v5770_v48  ;;  %5327 = vmatprep.subr.mxu0 %v5770_v48 }
 0x340   : > { %v1663_v59 = vpop.permute.xlu1 %1662  ;;  %5325 = vmatmul.mubr.msk.f32.vlgmr.msra.gmra.mrb[24].mxu1 %vm774_vm2, %v6077_v4  ;;  %v1740_v61 = vpop.permute.xlu0 %1739  ;;  %5320 = vmatmul.mubr.msk.f32.vlgmr.msra.gmra.mrb[38].mxu0 %vm774_vm2, %v6075_v3 }
 0x341   : > { %5328 = vmatpush3.xpose.msk.msra.mxu0 %vm774_vm2, %v1663_v59  ;;  %5333 = vmatpush3.xpose.msk.msra.mxu1 %vm774_vm2, %v1740_v61 }
 0x342   : > { %5329 = vmatprep.mubr.msk.f32.mxu0 %vm5771_vm3, %v5770_v48  ;;  %5334 = vmatprep.mubr.msk.f32.mxu1 %vm5771_vm3, %v5770_v48 }
 0x343   : > { %5342 = vmatprep.subr.mxu1 %v5770_v48  ;;  %5337 = vmatprep.subr.mxu0 %v5770_v48 }
 0x344   : > { %v1817_v62 = vpop.permute.xlu1 %1816  ;;  %5335 = vmatmul.mubr.msk.f32.vlgmr.msra.gmra.mrb[26].mxu1 %vm774_vm2, %v6085_v8  ;;  %v1894_v63 = vpop.permute.xlu0 %1893  ;;  %5330 = vmatmul.mubr.msk.f32.vlgmr.msra.gmra.mrb[40].mxu0 %vm774_vm2, %v6083_v7 }
 0x345   : > { %5338 = vmatpush3.xpose.msk.msra.mxu0 %vm774_vm2, %v1817_v62  ;;  %5343 = vmatpush3.xpose.msk.msra.mxu1 %vm774_vm2, %v1894_v63 }
 0x346   : > { %5339 = vmatprep.mubr.msk.f32.mxu0 %vm5771_vm3, %v5770_v48  ;;  %5344 = vmatprep.mubr.msk.f32.mxu1 %vm5771_vm3, %v5770_v48 }
 0x347   : > { %5347 = vmatprep.subr.mxu0 %v5770_v48  ;;  %5352 = vmatprep.subr.mxu1 %v5770_v48 }
 0x348   : > { %v1971_v0 = vpop.permute.xlu1 %1970  ;;  %5340 = vmatmul.mubr.msk.f32.vlgmr.msra.gmra.mrb[42].mxu0 %vm774_vm2, %v6091_v11  ;;  %5345 = vmatmul.mubr.msk.f32.vlgmr.msra.gmra.mrb[28].mxu1 %vm774_vm2, %v6093_v12  ;;  %v2048_v1 = vpop.permute.xlu0 %2047 }
 0x349   : > { %5348 = vmatpush3.xpose.msk.msra.mxu0 %vm774_vm2, %v1971_v0  ;;  %5353 = vmatpush3.xpose.msk.msra.mxu1 %vm774_vm2, %v2048_v1 }
 0x34a   : > { %5349 = vmatprep.mubr.msk.f32.mxu0 %vm5771_vm3, %v5770_v48  ;;  %5354 = vmatprep.mubr.msk.f32.mxu1 %vm5771_vm3, %v5770_v48 }
 0x34b   : > { %5357 = vmatprep.subr.mxu0 %v5770_v48  ;;  %5362 = vmatprep.subr.mxu1 %v5770_v48 }
 0x34c   : > { %5350 = vmatmul.mubr.msk.f32.vlgmr.msra.gmra.mrb[44].mxu0 %vm774_vm2, %v6099_v15  ;;  %v2125_v2 = vpop.permute.xlu1 %2124  ;;  %5355 = vmatmul.mubr.msk.f32.vlgmr.msra.gmra.mrb[30].mxu1 %vm774_vm2, %v6101_v50  ;;  %v2454_v3 = vpop.permute.xlu0 %2453 }
 0x34d   : > { %5358 = vmatpush3.xpose.msk.msra.mxu0 %vm774_vm2, %v2125_v2  ;;  %5359 = vmatprep.mubr.msk.f32.mxu0 %vm5771_vm3, %v5770_v48 }
 0x34e   : > { %5367 = vmatprep.subr.mxu0 %v5770_v48  ;;  %5364 = vmatprep.mubr.msk.f32.mxu1 %vm5771_vm3, %v5770_v48 }
 0x350   : > { %5360 = vmatmul.mubr.msk.f32.vlgmr.msra.gmra.mrb[46].mxu0 %vm774_vm2, %v6103_v51  ;;  %v2378_v4 = vpop.permute.xlu1 %2377 }
 0x351   : > { %5363 = vmatpush3.msra.mxu1 %v2378_v4  ;;  %5368 = vmatpush3.msra.mxu0 %v2454_v3 }
 0x352   : > { %5372 = vmatprep.subr.mxu1 %v5770_v48  ;;  %5369 = vmatprep.mubr.msk.f32.mxu0 %vm5771_vm3, %v5770_v48 }
 0x353   : > { %5377 = vmatprep.subr.mxu0 %v5770_v48 }
 0x403   : > { %v6227_v5 = vpop.f32.mrb[16].mxu1 }
 0x404   : > { %v5286_v6 = vpop.f32.mrb[17].mxu1  ;;  %v2201_v7 = vsel %vm2200_vm4, %v6227_v5, -inf }
 0x405   : > { %2202 = vmax.xlane.f32.xlu0 %v2201_v7 }
 0x407   : > { %v6231_v9 = vpop.f32.mrb[32].mxu0  ;;  %v6233_v10 = vpop.f32.mrb[18].mxu1 }
 0x408   : > { %v5291_v13 = vpop.f32.mrb[33].mxu0  ;;  %v5296_v14 = vpop.f32.mrb[19].mxu1  ;;  %v2204_v49 = vsel %vm2200_vm4, %v6231_v9, -inf  ;;  %v2207_v63 = vsel %vm2200_vm4, %v6233_v10, -inf }
 0x409   : > { %2205 = vmax.xlane.f32.xlu1 %v2204_v49 }
 0x40b   : > { %v6237_v53 = vpop.f32.mrb[34].mxu0  ;;  %v6239_v54 = vpop.f32.mrb[20].mxu1 }
 0x40c   : > { %v5301_v57 = vpop.f32.mrb[35].mxu0  ;;  %v5306_v58 = vpop.f32.mrb[21].mxu1  ;;  %v2213_v52 = vsel %vm2200_vm4, %v6239_v54, -inf  ;;  %v2210_v56 = vsel %vm2200_vm4, %v6237_v53, -inf }
 0x40d   : > { %2214 = vmax.xlane.f32.xlu1 %v2213_v52  ;;  %2211 = vmax.xlane.f32.xlu0 %v2210_v56 }
 0x40f   : > { %v6245_v55 = vpop.f32.mrb[36].mxu0  ;;  %v6247_v60 = vpop.f32.mrb[22].mxu1 }
 0x410   : > { %v5311_v59 = vpop.f32.mrb[37].mxu0  ;;  %v5316_v61 = vpop.f32.mrb[23].mxu1  ;;  %v2219_v62 = vsel %vm2200_vm4, %v6247_v60, -inf  ;;  %v2216_v6 = vsel %vm2200_vm4, %v6245_v55, -inf }
 0x411   : > { %2220 = vmax.xlane.f32.xlu1 %v2219_v62  ;;  %2208 = vmax.xlane.f32.xlu0 %v2207_v63 }
 0x413   : > { %v6253_v0 = vpop.f32.mrb[38].mxu0  ;;  %v6255_v1 = vpop.f32.mrb[24].mxu1 }
 0x414   : > { %v5321_v2 = vpop.f32.mrb[39].mxu0  ;;  %v5326_v3 = vpop.f32.mrb[25].mxu1  ;;  %v2225_v4 = vsel %vm2200_vm4, %v6255_v1, -inf  ;;  %v2222_v58 = vsel %vm2200_vm4, %v6253_v0, -inf }
 0x415   : > { %2226 = vmax.xlane.f32.xlu1 %v2225_v4  ;;  %2217 = vmax.xlane.f32.xlu0 %v2216_v6 }
 0x417   : > { %v6261_v7 = vpop.f32.mrb[40].mxu0  ;;  %v6263_v13 = vpop.f32.mrb[26].mxu1 }
 0x418   : > { %v5331_v14 = vpop.f32.mrb[41].mxu0  ;;  %v5336_v49 = vpop.f32.mrb[27].mxu1  ;;  %v2231_v57 = vsel %vm2200_vm4, %v6263_v13, -inf  ;;  %v2228_v63 = vsel %vm2200_vm4, %v6261_v7, -inf }
 0x419   : > { %2232 = vmax.xlane.f32.xlu1 %v2231_v57  ;;  %2223 = vmax.xlane.f32.xlu0 %v2222_v58 }
 0x41b   : > { %v6269_v52 = vpop.f32.mrb[42].mxu0  ;;  %v6271_v56 = vpop.f32.mrb[28].mxu1 }
 0x41c   : > { %v5341_v59 = vpop.f32.mrb[43].mxu0  ;;  %v5346_v61 = vpop.f32.mrb[29].mxu1  ;;  %v2237_v62 = vsel %vm2200_vm4, %v6271_v56, -inf  ;;  %v2234_v14 = vsel %vm2200_vm4, %v6269_v52, -inf }
 0x41d   : > { %2238 = vmax.xlane.f32.xlu1 %v2237_v62  ;;  %2229 = vmax.xlane.f32.xlu0 %v2228_v63  ;;  %v6299_v62 = vpop.permute.xlu1 %2529 }
 0x41f   : > { %v6277_v2 = vpop.f32.mrb[44].mxu0  ;;  %v6279_v3 = vpop.f32.mrb[30].mxu1 }
 0x420   : > { %v5351_v4 = vpop.f32.mrb[45].mxu0  ;;  %v5356_v6 = vpop.f32.mrb[31].mxu1  ;;  %v2240_v58 = vsel %vm2200_vm4, %v6277_v2, -inf  ;;  %v2243_v61 = vsel %vm2200_vm4, %v6279_v3, -inf }
 0x421   : > { %2235 = vmax.xlane.f32.xlu0 %v2234_v14  ;;  %v6301_v63 = vpop.permute.xlu1 %2681  ;;  %v6303_v4 = vpop.permute.xlu0 %2605 }
 0x423   : > { %v6283_v49 = vpop.f32.mrb[46].mxu0 }
 0x424   : > { %v5361_v57 = vpop.f32.mrb[47].mxu0  ;;  %v2246_v59 = vsel %vm2200_vm4, %v6283_v49, -inf }
 0x425   : > { %2241 = vmax.xlane.f32.xlu0 %v2240_v58  ;;  %v6307_v6 = vpop.permute.xlu0 %2833 }
 0x429   : > { %2247 = vmax.xlane.f32.xlu0 %v2246_v59 }
 0x42e   : > { %3213 = vrot.lane.b32.xlu1 %v6091_v11, %s5773_s12  ;;  %v6305_v11 = vpop.permute.xlu1 %2757 }
 0x43f   : > { %3137 = vrot.lane.b32.xlu0 %v6085_v8, %s5773_s12  ;;  %v6309_v8 = vpop.permute.xlu1 %2909 }
 0x443   : > { %3289 = vrot.lane.b32.xlu0 %v6093_v12, %s5773_s12  ;;  %v6311_v12 = vpop.permute.xlu0 %2985  ;;  %v6313_v14 = vpop.permute.xlu1 %3061 }
 0x452   : > { %2244 = vmax.xlane.f32.xlu1 %v2243_v61 }
 0x463   : > { %3365 = vrot.lane.b32.xlu1 %v6099_v15, %s5773_s12 }
 0x492   : > { %v2203_v57 = vpop.xlane.xlu0 %2202 }
 0x493   : > { %v2249_v58 = vsub.f32 %v6227_v5, %v2203_v57 }
 0x495   : > { %v2265_v15 = vmul.f32 1.442695, %v2249_v58 }
 0x496   : > { %v2206_v59 = vpop.xlane.xlu1 %2205 }
 0x497   : > { %5634 = vpow2.f32 %v2265_v15  ;;  %v2250_v61 = vsub.f32 %v6231_v9, %v2206_v59 }
 0x499   : > { %v2267_v47 = vmul.f32 1.442695, %v2250_v61 }
 0x49a   : > { %v2215_v45 = vpop.xlane.xlu1 %2214  ;;  %v2212_v43 = vpop.xlane.xlu0 %2211 }
 0x49b   : > { %5636 = vpow2.f32 %v2267_v47  ;;  %v2252_v42 = vsub.f32 %v6237_v53, %v2212_v43  ;;  %v2253_v38 = vsub.f32 %v6239_v54, %v2215_v45 }
 0x49d   : > { %v2271_v39 = vmul.f32 1.442695, %v2252_v42  ;;  %v2273_v58 = vmul.f32 1.442695, %v2253_v38 }
 0x49e   : > { %v2221_v35 = vpop.xlane.xlu1 %2220  ;;  %v2209_v34 = vpop.xlane.xlu0 %2208 }
 0x49f   : > { %v2251_v31 = vsub.f32 %v6233_v10, %v2209_v34  ;;  %5638 = vpow2.f32 %v2271_v39  ;;  %v2255_v9 = vsub.f32 %v6247_v60, %v2221_v35 }
 0x4a1   : > { %v6320_v5 = vpop.eup %5634  ;;  %v2269_v57 = vmul.f32 1.442695, %v2251_v31  ;;  %v2277_v34 = vmul.f32 1.442695, %v2255_v9 }
 0x4a2   : > { %v2227_v15 = vpop.xlane.xlu1 %2226  ;;  %v2218_v59 = vpop.xlane.xlu0 %2217  ;;  %v2297_v47 = vsel %vm2200_vm4, %v6320_v5, 0.0 }
 0x4a3   : > { %v2254_v42 = vsub.f32 %v6245_v55, %v2218_v59  ;;  %2298 = vadd.xlane.f32.xlu1 %v2297_v47  ;;  %5640 = vpow2.f32 %v2269_v57  ;;  %v2257_v39 = vsub.f32 %v6255_v1, %v2227_v15 }
 0x4a4   : > { %5642 = vpow2.f32 %v2273_v58 }
 0x4a5   : > { %v6326_v43 = vpop.eup %5636  ;;  %v2275_v45 = vmul.f32 1.442695, %v2254_v42  ;;  %v2281_v55 = vmul.f32 1.442695, %v2257_v39 }
 0x4a6   : > { %v2233_v31 = vpop.xlane.xlu1 %2232  ;;  %v2224_v38 = vpop.xlane.xlu0 %2223  ;;  %v2300_v35 = vsel %vm2200_vm4, %v6326_v43, 0.0 }
 0x4a7   : > { %v2256_v10 = vsub.f32 %v6253_v0, %v2224_v38  ;;  %2301 = vadd.xlane.f32.xlu0 %v2300_v35  ;;  %5644 = vpow2.f32 %v2275_v45  ;;  %v2259_v60 = vsub.f32 %v6263_v13, %v2233_v31 }
 0x4a8   : > { %5646 = vpow2.f32 %v2277_v34 }
 0x4a9   : > { %v2279_v53 = vmul.f32 1.442695, %v2256_v10  ;;  %v6332_v54 = vpop.eup %5638  ;;  %v2285_v15 = vmul.f32 1.442695, %v2259_v60 }
 0x4aa   : > { %v2230_v61 = vpop.xlane.xlu0 %2229  ;;  %v2239_v57 = vpop.xlane.xlu1 %2238  ;;  %v2306_v58 = vsel %vm2200_vm4, %v6332_v54, 0.0 }
 0x4ab   : > { %v2258_v1 = vsub.f32 %v6261_v7, %v2230_v61  ;;  %5648 = vpow2.f32 %v2279_v53  ;;  %2307 = vadd.xlane.f32.xlu0 %v2306_v58  ;;  %v2261_v59 = vsub.f32 %v6271_v56, %v2239_v57 }
 0x4ac   : > { %5650 = vpow2.f32 %v2281_v55 }
 0x4ad   : > { %v2283_v9 = vmul.f32 1.442695, %v2258_v1  ;;  %v6338_v0 = vpop.eup %5640  ;;  %v2289_v39 = vmul.f32 1.442695, %v2261_v59 }
 0x4ae   : > { %v2236_v47 = vpop.xlane.xlu0 %2235  ;;  %v2303_v13 = vsel %vm2200_vm4, %v6338_v0, 0.0  ;;  %v6344_v45 = vpop.eup %5642 }
 0x4af   : > { %v2260_v42 = vsub.f32 %v6269_v52, %v2236_v47  ;;  %5652 = vpow2.f32 %v2283_v9  ;;  %2304 = vadd.xlane.f32.xlu1 %v2303_v13  ;;  %v2309_v56 = vsel %vm2200_vm4, %v6344_v45, 0.0 }
 0x4b0   : > { %5654 = vpow2.f32 %v2285_v15 }
 0x4b1   : > { %v2287_v7 = vmul.f32 1.442695, %v2260_v42  ;;  %v6346_v34 = vpop.eup %5644 }
 0x4b2   : > { %v2242_v31 = vpop.xlane.xlu0 %2241  ;;  %v2312_v52 = vsel %vm2200_vm4, %v6346_v34, 0.0  ;;  %v6353_v35 = vpop.eup %5646 }
 0x4b3   : > { %5656 = vpow2.f32 %v2287_v7  ;;  %v2262_v38 = vsub.f32 %v6277_v2, %v2242_v31  ;;  %2310 = vadd.xlane.f32.xlu1 %v2309_v56  ;;  %2313 = vadd.xlane.f32.xlu0 %v2312_v52  ;;  %v2315_v2 = vsel %vm2200_vm4, %v6353_v35, 0.0  ;;  %v6390_v52 = vpop.permute.xlu1 %3213 }
 0x4b4   : > { %5658 = vpow2.f32 %v2289_v39 }
 0x4b5   : > { %v2291_v10 = vmul.f32 1.442695, %v2262_v38  ;;  %v6355_v53 = vpop.eup %5648 }
 0x4b6   : > { %v2248_v55 = vpop.xlane.xlu0 %2247  ;;  %v2318_v61 = vsel %vm2200_vm4, %v6355_v53, 0.0  ;;  %v6362_v57 = vpop.eup %5650 }
 0x4b7   : > { %5660 = vpow2.f32 %v2291_v10  ;;  %v2264_v60 = vsub.f32 %v6283_v49, %v2248_v55  ;;  %2316 = vadd.xlane.f32.xlu1 %v2315_v2  ;;  %2319 = vadd.xlane.f32.xlu0 %v2318_v61  ;;  %v2321_v9 = vsel %vm2200_vm4, %v6362_v57, 0.0 }
 0x4b9   : > { %v2295_v1 = vmul.f32 1.442695, %v2264_v60  ;;  %v6364_v58 = vpop.eup %5652 }
 0x4ba   : > { %v2324_v49 = vsel %vm2200_vm4, %v6364_v58, 0.0  ;;  %v6370_v15 = vpop.eup %5654 }
 0x4bb   : > { %5662 = vpow2.f32 %v2295_v1  ;;  %2322 = vadd.xlane.f32.xlu1 %v2321_v9  ;;  %2325 = vadd.xlane.f32.xlu0 %v2324_v49  ;;  %v2327_v42 = vsel %vm2200_vm4, %v6370_v15, 0.0  ;;  %v6401_v1 = vpop.permute.xlu0 %3137 }
 0x4bd   : > { %v6372_v59 = vpop.eup %5656 }
 0x4be   : > { %v2330_v47 = vsel %vm2200_vm4, %v6372_v59, 0.0  ;;  %v6378_v13 = vpop.eup %5658 }
 0x4bf   : > { %2328 = vadd.xlane.f32.xlu1 %v2327_v42  ;;  %2331 = vadd.xlane.f32.xlu0 %v2330_v47  ;;  %v2333_v31 = vsel %vm2200_vm4, %v6378_v13, 0.0  ;;  %v6405_v49 = vpop.permute.xlu0 %3289 }
 0x4c1   : > { %v6380_v7 = vpop.eup %5660 }
 0x4c2   : > { %v2336_v39 = vsel %vm2200_vm4, %v6380_v7, 0.0 }
 0x4c3   : > { %2334 = vadd.xlane.f32.xlu1 %v2333_v31  ;;  %2337 = vadd.xlane.f32.xlu0 %v2336_v39 }
 0x4c5   : > { %v6386_v38 = vpop.eup %5662 }
 0x4c6   : > { %v2342_v56 = vsel %vm2200_vm4, %v6386_v38, 0.0 }
 0x4c7   : > { %2343 = vadd.xlane.f32.xlu0 %v2342_v56 }
 0x4dd   : > { %3441 = vrot.lane.b32.xlu0 %v6101_v50, %s5773_s12 }
 0x4df   : > { %v2245_v10 = vpop.xlane.xlu1 %2244 }
 0x4e0   : > { %v2263_v55 = vsub.f32 %v6279_v3, %v2245_v10 }
 0x4e2   : > { %v2293_v60 = vmul.f32 1.442695, %v2263_v55 }
 0x4e3   : > { %v6403_v9 = vpop.permute.xlu1 %3365 }
 0x4e4   : > { %5664 = vpow2.f32 %v2293_v60 }
 0x4ee   : > { %v6395_v2 = vpop.eup %5664 }
 0x4ef   : > { %v2339_v61 = vsel %vm2200_vm4, %v6395_v2, 0.0 }
 0x4f0   : > { %2340 = vadd.xlane.f32.xlu1 %v2339_v61 }
 0x501   : > { %3517 = vrot.lane.b32.xlu1 %v6103_v51, %s5773_s12 }
 0x530   : > { %v2299_v50 = vpop.xlane.xlu1 %2298 }
 0x531   : > { %5666 = vrcp.f32 %v2299_v50 }
 0x534   : > { %v2302_v3 = vpop.xlane.xlu0 %2301 }
 0x535   : > { %5668 = vrcp.f32 %v2302_v3 }
 0x538   : > { %v2308_v47 = vpop.xlane.xlu0 %2307 }
 0x539   : > { %5670 = vrcp.f32 %v2308_v47 }
 0x53b   : > { %v5667_v42 = vpop.eup %5666 }
 0x53c   : > { %v2361_v39 = vmul.f32 %v5667_v42, %v6320_v5  ;;  %v2305_v31 = vpop.xlane.xlu1 %2304 }
 0x53d   : > { %5672 = vrcp.f32 %v2305_v31 }
 0x53e   : > { %5365 = vmatmul.mubr.msk.f32.vlgmr.msra.gmra.mrb[32].mxu1 %vm2200_vm4, %v2361_v39 }
 0x53f   : > { %v5669_v51 = vpop.eup %5668  ;;  %5373 = vmatpush3.msra.mxu1 %v6299_v62  ;;  %5374 = vmatprep.mubr.msk.f32.mxu1 %vm5771_vm3, %v5770_v48 }
 0x540   : > { %v2362_v56 = vmul.f32 %v5669_v51, %v6326_v43  ;;  %5382 = vmatprep.subr.mxu1 %v5770_v48  ;;  %v2311_v10 = vpop.xlane.xlu1 %2310  ;;  %v2314_v55 = vpop.xlane.xlu0 %2313 }
 0x541   : > { %5674 = vrcp.f32 %v2311_v10 }
 0x542   : > { %5370 = vmatmul.mubr.msk.f32.vlgmr.msra.gmra.mrb[48].mxu0 %vm2200_vm4, %v2362_v56  ;;  %5676 = vrcp.f32 %v2314_v55  ;;  %v3594_v55 = vld [vmem:[%s7211_s5 + $0x8] sm:$0xff] }
 0x543   : > { %5378 = vmatpush3.msra.mxu0 %v6303_v4  ;;  %5379 = vmatprep.mubr.msk.f32.mxu0 %vm5771_vm3, %v5770_v48  ;;  %v5671_v5 = vpop.eup %5670 }
 0x544   : > { %5387 = vmatprep.subr.mxu0 %v5770_v48  ;;  %v2364_v62 = vmul.f32 %v5671_v5, %v6332_v54  ;;  %v2317_v60 = vpop.xlane.xlu1 %2316  ;;  %v2320_v43 = vpop.xlane.xlu0 %2319 }
 0x545   : > { %5678 = vrcp.f32 %v2317_v60 }
 0x546   : > { %5680 = vrcp.f32 %v2320_v43  ;;  %5380 = vmatmul.mubr.msk.f32.vlgmr.msra.gmra.mrb[50].mxu0 %vm2200_vm4, %v2364_v62 }
 0x547   : > { %v5673_v61 = vpop.eup %5672  ;;  %5388 = vmatpush3.msra.mxu0 %v6305_v11  ;;  %5389 = vmatprep.mubr.msk.f32.mxu0 %vm5771_vm3, %v5770_v48 }
 0x548   : > { %v2363_v4 = vmul.f32 %v5673_v61, %v6338_v0  ;;  %v2323_v50 = vpop.xlane.xlu1 %2322  ;;  %v2326_v3 = vpop.xlane.xlu0 %2325  ;;  %5397 = vmatprep.subr.mxu0 %v5770_v48 }
 0x549   : > { %5682 = vrcp.f32 %v2323_v50 }
 0x54a   : > { %5684 = vrcp.f32 %v2326_v3  ;;  %5375 = vmatmul.mubr.msk.f32.vlgmr.msra.gmra.mrb[34].mxu1 %vm2200_vm4, %v2363_v4 }
 0x54b   : > { %v5675_v54 = vpop.eup %5674  ;;  %5383 = vmatpush3.msra.mxu1 %v6301_v63  ;;  %5384 = vmatprep.mubr.msk.f32.mxu1 %vm5771_vm3, %v5770_v48 }
 0x54c   : > { %v5677_v11 = vpop.eup %5676  ;;  %v2365_v47 = vmul.f32 %v5675_v54, %v6344_v45  ;;  %v2329_v42 = vpop.xlane.xlu1 %2328  ;;  %5392 = vmatprep.subr.mxu1 %v5770_v48 }
 0x54d   : > { %v2332_v39 = vpop.xlane.xlu0 %2331  ;;  %v2366_v0 = vmul.f32 %v5677_v11, %v6346_v34  ;;  %5686 = vrcp.f32 %v2329_v42 }
 0x54e   : > { %5688 = vrcp.f32 %v2332_v39  ;;  %5385 = vmatmul.mubr.msk.f32.vlgmr.msra.gmra.mrb[36].mxu1 %vm2200_vm4, %v2365_v47 }
 0x54f   : > { %v5679_v31 = vpop.eup %5678  ;;  %5390 = vmatmul.mubr.msk.f32.vlgmr.msra.gmra.mrb[52].mxu0 %vm2200_vm4, %v2366_v0  ;;  %5393 = vmatpush3.msra.mxu1 %v6307_v6 }
 0x550   : > { %v5681_v63 = vpop.eup %5680  ;;  %v2367_v51 = vmul.f32 %v5679_v31, %v6353_v35  ;;  %5398 = vmatpush3.msra.mxu0 %v6309_v8  ;;  %v2335_v45 = vpop.xlane.xlu1 %2334  ;;  %5394 = vmatprep.mubr.msk.f32.mxu1 %vm5771_vm3, %v5770_v48 }
 0x551   : > { %v2338_v56 = vpop.xlane.xlu0 %2337  ;;  %v2368_v34 = vmul.f32 %v5681_v63, %v6355_v53  ;;  %5690 = vrcp.f32 %v2335_v45  ;;  %5399 = vmatprep.mubr.msk.f32.mxu0 %vm5771_vm3, %v5770_v48  ;;  %5402 = vmatprep.subr.mxu1 %v5770_v48 }
 0x552   : > { %5692 = vrcp.f32 %v2338_v56  ;;  %5407 = vmatprep.subr.mxu0 %v5770_v48  ;;  %5395 = vmatmul.mubr.msk.f32.vlgmr.msra.gmra.mrb[38].mxu1 %vm2200_vm4, %v2367_v51 }
 0x553   : > { %v5683_v6 = vpop.eup %5682  ;;  %5400 = vmatmul.mubr.msk.f32.vlgmr.msra.gmra.mrb[54].mxu0 %vm2200_vm4, %v2368_v34  ;;  %5403 = vmatpush3.msra.mxu1 %v6311_v12 }
 0x554   : > { %v5685_v8 = vpop.eup %5684  ;;  %v2369_v35 = vmul.f32 %v5683_v6, %v6362_v57  ;;  %5408 = vmatpush3.msra.mxu0 %v6313_v14  ;;  %5404 = vmatprep.mubr.msk.f32.mxu1 %vm5771_vm3, %v5770_v48 }
 0x555   : > { %v2370_v53 = vmul.f32 %v5685_v8, %v6364_v58  ;;  %5409 = vmatprep.mubr.msk.f32.mxu0 %vm5771_vm3, %v5770_v48  ;;  %5412 = vmatprep.subr.mxu1 %v5770_v48  ;;  %v2344_v10 = vpop.xlane.xlu0 %2343 }
 0x556   : > { %5417 = vmatprep.subr.mxu0 %v5770_v48  ;;  %5405 = vmatmul.mubr.msk.f32.vlgmr.msra.gmra.mrb[40].mxu1 %vm2200_vm4, %v2369_v35  ;;  %5694 = vrcp.f32 %v2344_v10 }
 0x557   : > { %v5687_v12 = vpop.eup %5686  ;;  %5410 = vmatmul.mubr.msk.f32.vlgmr.msra.gmra.mrb[56].mxu0 %vm2200_vm4, %v2370_v53  ;;  %5413 = vmatpush3.msra.mxu1 %v6401_v1 }
 0x558   : > { %v5689_v14 = vpop.eup %5688  ;;  %v2371_v57 = vmul.f32 %v5687_v12, %v6370_v15  ;;  %5418 = vmatpush3.msra.mxu0 %v6390_v52  ;;  %5414 = vmatprep.mubr.msk.f32.mxu1 %vm5771_vm3, %v5770_v48 }
 0x559   : > { %v2372_v58 = vmul.f32 %v5689_v14, %v6372_v59  ;;  %5419 = vmatprep.mubr.msk.f32.mxu0 %vm5771_vm3, %v5770_v48  ;;  %5422 = vmatprep.subr.mxu1 %v5770_v48  ;;  %v3593_v59 = vld [vmem:[%s7211_s5] sm:$0xff] }
 0x55a   : > { %5427 = vmatprep.subr.mxu0 %v5770_v48  ;;  %5415 = vmatmul.mubr.msk.f32.vlgmr.msra.gmra.mrb[42].mxu1 %vm2200_vm4, %v2371_v57 }
 0x55b   : > { %v5691_v1 = vpop.eup %5690  ;;  %5420 = vmatmul.mubr.msk.f32.vlgmr.msra.gmra.mrb[58].mxu0 %vm2200_vm4, %v2372_v58  ;;  %5423 = vmatpush3.msra.mxu1 %v6405_v49 }
 0x55c   : > { %v5693_v15 = vpop.eup %5692  ;;  %v2373_v52 = vmul.f32 %v5691_v1, %v6378_v13  ;;  %5428 = vmatpush3.msra.mxu0 %v6403_v9  ;;  %5424 = vmatprep.mubr.msk.f32.mxu1 %vm5771_vm3, %v5770_v48  ;;  %v3442_v13 = vpop.permute.xlu0 %3441  ;;  %v5586_v9 = vpack.c.bf16 %v3594_v55, %v3593_v59 }
 0x55d   : > { %v2374_v5 = vmul.f32 %v5693_v15, %v6380_v7  ;;  %5429 = vmatprep.mubr.msk.f32.mxu0 %vm5771_vm3, %v5770_v48  ;;  %5432 = vmatprep.subr.mxu1 %v5770_v48 }
 0x55e   : > { %5425 = vmatmul.mubr.msk.f32.vlgmr.msra.gmra.mrb[44].mxu1 %vm2200_vm4, %v2373_v52  ;;  %5437 = vmatprep.subr.mxu0 %v5770_v48 }
 0x55f   : > { %5430 = vmatmul.mubr.msk.f32.vlgmr.msra.gmra.mrb[60].mxu0 %vm2200_vm4, %v2374_v5  ;;  %5433 = vmatpush3.msra.mxu1 %v3442_v13 }
 0x560   : > { %5439 = vmatprep.mubr.msk.f32.mxu0 %vm5771_vm3, %v5770_v48  ;;  %5434 = vmatprep.mubr.msk.f32.mxu1 %vm5771_vm3, %v5770_v48  ;;  %v5695_v49 = vpop.eup %5694  ;;  %v3595_v48 = vld [vmem:[%s7211_s5 + $0x10] sm:$0xff] }
 0x561   : > { %5618 = vmatprep.subr.bf16.mxu1 %v5586_v9  ;;  %v2376_v62 = vmul.f32 %v5695_v49, %v6386_v38  ;;  %v3596_v38 = vld [vmem:[%s7211_s5 + $0x18] sm:$0xff] }
 0x562   : > { %v5590_v4 = vpack.c.bf16 %v3596_v38, %v3595_v48 }
 0x57d   : > { %v2341_v7 = vpop.xlane.xlu1 %2340 }
 0x57e   : > { %5696 = vrcp.f32 %v2341_v7  ;;  %v6522_v7 = vld [vmem:[%s7215_s9 + $0x1] ss:$0 sm:$0xff] }
 0x581   : > { %v3518_v60 = vpop.permute.xlu1 %3517 }
 0x582   : > { %5438 = vmatpush3.msra.mxu0 %v3518_v60 }
 0x583   : > { %5440 = vmatmul.mubr.msk.f32.vlgmr.msra.gmra.mrb[62].mxu0 %vm2200_vm4, %v2376_v62  ;;  %5587 = vmatprep.subr.bf16.mxu0 %v5586_v9 }
 0x584   : > { %5589 = vmatpush3.bf16.msra.mxu0 %v5586_v9 }
 0x585   : > { %5591 = vmatprep.subr.bf16.mxu0 %v5590_v4 }
 0x588   : > { %v5697_v43 = vpop.eup %5696  ;;  %5593 = vmatpush3.bf16.msra.mxu0 %v5590_v4 }
 0x589   : > { %v2375_v61 = vmul.f32 %v5697_v43, %v6395_v2 }
 0x58b   : > { %5435 = vmatmul.mubr.msk.f32.vlgmr.msra.gmra.mrb[46].mxu1 %vm2200_vm4, %v2375_v61 }
 0x58c   : > { %5620 = vmatpush3.bf16.msra.mxu1 %v5586_v9 }
 0x58d   : > { %5619 = vmatprep.subr.bf16.mxu1 %v5590_v4 }
 0x590   : > { %5621 = vmatpush3.bf16.msra.mxu1 %v5590_v4 }
 0x611   : > { %v2449_v50 = vpop.f32.mrb[32].mxu1 }
 0x612   : > { %v5366_v3 = vpop.f32.mrb[33].mxu1  ;;  %5450 = vmatprep.mubr.msk.f32.mxu0 %vm774_vm2, %v2449_v50 }
 0x615   : > { %v2525_v2 = vpop.f32.mrb[48].mxu0 }
 0x616   : > { %v5371_v54 = vpop.f32.mrb[49].mxu0  ;;  %5451 = vmatmul.mubr.msk.f32.vlgmr.msra.gmra.mrb[64].mxu0 %vm774_vm2, %v2525_v2 }
 0x619   : > { %v2677_v11 = vpop.f32.mrb[50].mxu0 }
 0x61a   : > { %v5381_v47 = vpop.f32.mrb[51].mxu0 }
 0x61d   : > { %v2601_v42 = vpop.f32.mrb[34].mxu1 }
 0x61e   : > { %v5376_v39 = vpop.f32.mrb[35].mxu1  ;;  %5453 = vmatprep.mubr.msk.f32.mxu0 %vm774_vm2, %v2601_v42 }
 0x61f   : > { %5454 = vmatmul.mubr.msk.f32.gmra.mrb[66].mxu0 %vm774_vm2, %v2677_v11 }
 0x621   : > { %v2753_v0 = vpop.f32.mrb[36].mxu1 }
 0x622   : > { %v2829_v31 = vpop.f32.mrb[52].mxu0  ;;  %v5386_v63 = vpop.f32.mrb[37].mxu1  ;;  %5456 = vmatprep.mubr.msk.f32.mxu0 %vm774_vm2, %v2753_v0 }
 0x623   : > { %v5391_v51 = vpop.f32.mrb[53].mxu0  ;;  %5457 = vmatmul.mubr.msk.f32.gmra.mrb[68].mxu0 %vm774_vm2, %v2829_v31 }
 0x625   : > { %v2905_v45 = vpop.f32.mrb[38].mxu1 }
 0x626   : > { %v2981_v56 = vpop.f32.mrb[54].mxu0  ;;  %v5396_v34 = vpop.f32.mrb[39].mxu1  ;;  %5459 = vmatprep.mubr.msk.f32.mxu0 %vm774_vm2, %v2905_v45 }
 0x627   : > { %v5401_v6 = vpop.f32.mrb[55].mxu0  ;;  %5460 = vmatmul.mubr.msk.f32.gmra.mrb[70].mxu0 %vm774_vm2, %v2981_v56 }
 0x629   : > { %v3057_v8 = vpop.f32.mrb[40].mxu1 }
 0x62a   : > { %v3133_v35 = vpop.f32.mrb[56].mxu0  ;;  %v5406_v53 = vpop.f32.mrb[41].mxu1  ;;  %5462 = vmatprep.mubr.msk.f32.mxu1 %vm774_vm2, %v3057_v8 }
 0x62b   : > { %v5411_v12 = vpop.f32.mrb[57].mxu0  ;;  %5463 = vmatmul.mubr.msk.f32.vlgmr.msra.gmra.mrb[48].mxu1 %vm774_vm2, %v3133_v35  ;;  %v7228_v53 = vmax.f32 %v5987_v32, 0.0 }
 0x62d   : > { %v3209_v14 = vpop.f32.mrb[42].mxu1 }
 0x62e   : > { %v3285_v57 = vpop.f32.mrb[58].mxu0  ;;  %v5416_v10 = vpop.f32.mrb[43].mxu1  ;;  %5465 = vmatprep.mubr.msk.f32.mxu1 %vm774_vm2, %v3209_v14 }
 0x62f   : > { %v5421_v58 = vpop.f32.mrb[59].mxu0  ;;  %5466 = vmatmul.mubr.msk.f32.gmra.mrb[50].mxu1 %vm774_vm2, %v3285_v57 }
 0x630   : > { %v7229_v58 = vmax.f32 %v6004_v37, 0.0  ;;  %v7231_v37 = vmax.f32 %v6016_v41, 0.0 }
 0x631   : > { %v3361_v1 = vpop.f32.mrb[44].mxu1 }
 0x632   : > { %v3437_v15 = vpop.f32.mrb[60].mxu0  ;;  %v5426_v52 = vpop.f32.mrb[45].mxu1  ;;  %5468 = vmatprep.mubr.msk.f32.mxu1 %vm774_vm2, %v3361_v1 }
 0x633   : > { %v5431_v59 = vpop.f32.mrb[61].mxu0  ;;  %5469 = vmatmul.mubr.msk.f32.gmra.mrb[52].mxu1 %vm774_vm2, %v3437_v15 }
 0x656   : > { %v3589_v55 = vpop.f32.mrb[62].mxu0 }
 0x657   : > { %v5441_v5 = vpop.f32.mrb[63].mxu0 }
 0x658   : > { %v7230_v5 = vmax.f32 %v5999_v36, 0.0 }
 0x65e   : > { %v3513_v13 = vpop.f32.mrb[46].mxu1 }
 0x65f   : > { %v5436_v9 = vpop.f32.mrb[47].mxu1  ;;  %5471 = vmatprep.mubr.msk.f32.mxu1 %vm774_vm2, %v3513_v13 }
 0x660   : > { %5472 = vmatmul.mubr.msk.f32.gmra.mrb[54].mxu1 %vm774_vm2, %v3589_v55 }
 0x6e9   : > { %v5452_v49 = vpop.f32.mrb[64].mxu0 }
 0x6ea   : > { %v3721_v62 = vadd.f32 %v5452_v49, %v6522_v7  ;;  %v3715_v60 = vpop.f32.mrb[65].mxu0 }
 0x6eb   : > { %v3716_v43 = vadd.f32 %v6522_v7, %v3715_v60  ;;  %v7232_v60 = vmax.f32 %v6011_v40, 0.0  ;;  %v7234_v40 = vmax.f32 %v6029_v46, 0.0 }
 0x6ec   : > { %v6528_v61 = vadd.f32 %v3721_v62, %v748_v19 }
 0x6ed   : > { %v6532_v48 = vadd.f32 %v3716_v43, %v747_v18 }
 0x6ee   : > { %v3813_v38 = vsel %vm774_vm2, %v6528_v61, 0.0 }
 0x6ef   : > { %3814 = vadd.xlane.f32.xlu1 %v3813_v38  ;;  %v3810_v4 = vsel %vm774_vm2, %v6532_v48, 0.0 }
 0x6f0   : > { %3811 = vadd.xlane.f32.xlu0 %v3810_v4 }
 0x6f2   : > { %v5455_v50 = vpop.f32.mrb[66].mxu0 }
 0x6f3   : > { %v3731_v3 = vadd.f32 %v5455_v50, %v6522_v7  ;;  %v3725_v2 = vpop.f32.mrb[67].mxu0 }
 0x6f4   : > { %v3726_v16 = vadd.f32 %v6522_v7, %v3725_v2 }
 0x6f5   : > { %v6546_v54 = vadd.f32 %v3731_v3, %v750_v23  ;;  %v7233_v3 = vmax.f32 %v6023_v44, 0.0 }
 0x6f6   : > { %v5458_v19 = vpop.f32.mrb[68].mxu0  ;;  %v6542_v17 = vadd.f32 %v3726_v16, %v749_v22 }
 0x6f7   : > { %v3735_v18 = vpop.f32.mrb[69].mxu0  ;;  %v3741_v11 = vadd.f32 %v5458_v19, %v6522_v7  ;;  %v3819_v22 = vsel %vm774_vm2, %v6546_v54, 0.0 }
 0x6f8   : > { %v3736_v47 = vadd.f32 %v6522_v7, %v3735_v18  ;;  %v3816_v42 = vsel %vm774_vm2, %v6542_v17, 0.0 }
 0x6f9   : > { %3817 = vadd.xlane.f32.xlu0 %v3816_v42  ;;  %v6564_v63 = vadd.f32 %v3741_v11, %v752_v27  ;;  %v7226_v27 = vmax.f32 %v5975_v28, 0.0 }
 0x6fa   : > { %v5461_v39 = vpop.f32.mrb[70].mxu0  ;;  %v6554_v0 = vadd.f32 %v3736_v47, %v751_v26 }
 0x6fb   : > { %v3745_v21 = vpop.f32.mrb[71].mxu0  ;;  %v3751_v20 = vadd.f32 %v5461_v39, %v6522_v7  ;;  %v3825_v24 = vsel %vm774_vm2, %v6564_v63, 0.0 }
 0x6fc   : > { %v3746_v23 = vadd.f32 %v6522_v7, %v3745_v21  ;;  %v3822_v31 = vsel %vm774_vm2, %v6554_v0, 0.0 }
 0x6fd   : > { %3823 = vadd.xlane.f32.xlu1 %v3822_v31  ;;  %3820 = vadd.xlane.f32.xlu0 %v3819_v22  ;;  %v6578_v6 = vadd.f32 %v3751_v20, %v7226_v27 }
 0x6fe   : > { %v5464_v25 = vpop.f32.mrb[48].mxu1  ;;  %v6568_v26 = vadd.f32 %v3746_v23, %v753_v30  ;;  %v7227_v30 = vmax.f32 %v5992_v33, 0.0 }
 0x6ff   : > { %v3761_v51 = vadd.f32 %v5464_v25, %v6522_v7  ;;  %v3755_v45 = vpop.f32.mrb[49].mxu1  ;;  %v3831_v28 = vsel %vm774_vm2, %v6578_v6, 0.0 }
 0x700   : > { %v3756_v56 = vadd.f32 %v6522_v7, %v3755_v45  ;;  %v3828_v34 = vsel %vm774_vm2, %v6568_v26, 0.0 }
 0x701   : > { %3829 = vadd.xlane.f32.xlu1 %v3828_v34  ;;  %3826 = vadd.xlane.f32.xlu0 %v3825_v24  ;;  %v6586_v12 = vadd.f32 %v3761_v51, %v7228_v53 }
 0x702   : > { %v5467_v29 = vpop.f32.mrb[50].mxu1  ;;  %v6582_v8 = vadd.f32 %v3756_v56, %v7227_v30 }
 0x703   : > { %v3765_v35 = vpop.f32.mrb[51].mxu1  ;;  %v3771_v14 = vadd.f32 %v5467_v29, %v6522_v7  ;;  %v3837_v15 = vsel %vm774_vm2, %v6586_v12, 0.0 }
 0x704   : > { %v3766_v57 = vadd.f32 %v6522_v7, %v3765_v35  ;;  %v3834_v10 = vsel %vm774_vm2, %v6582_v8, 0.0 }
 0x705   : > { %3832 = vadd.xlane.f32.xlu0 %v3831_v28  ;;  %3835 = vadd.xlane.f32.xlu1 %v3834_v10  ;;  %v6606_v13 = vadd.f32 %v3771_v14, %v7230_v5 }
 0x706   : > { %v5470_v33 = vpop.f32.mrb[52].mxu1  ;;  %v6596_v1 = vadd.f32 %v3766_v57, %v7229_v58 }
 0x707   : > { %v3775_v32 = vpop.f32.mrb[53].mxu1  ;;  %v3781_v52 = vadd.f32 %v5470_v33, %v6522_v7  ;;  %v3843_v49 = vsel %vm774_vm2, %v6606_v13, 0.0 }
 0x708   : > { %v3776_v59 = vadd.f32 %v6522_v7, %v3775_v32  ;;  %v3840_v55 = vsel %vm774_vm2, %v6596_v1, 0.0 }
 0x709   : > { %3838 = vadd.xlane.f32.xlu0 %v3837_v15  ;;  %3841 = vadd.xlane.f32.xlu1 %v3840_v55  ;;  %v6618_v43 = vadd.f32 %v3781_v52, %v7232_v60 }
 0x70a   : > { %v6610_v9 = vadd.f32 %v3776_v59, %v7231_v37 }
 0x70b   : > { %v3849_v36 = vsel %vm774_vm2, %v6618_v43, 0.0 }
 0x70c   : > { %v3846_v62 = vsel %vm774_vm2, %v6610_v9, 0.0 }
 0x70d   : > { %3844 = vadd.xlane.f32.xlu0 %v3843_v49  ;;  %3847 = vadd.xlane.f32.xlu1 %v3846_v62 }
 0x711   : > { %3850 = vadd.xlane.f32.xlu0 %v3849_v36 }
 0x733   : > { %v5473_v38 = vpop.f32.mrb[54].mxu1 }
 0x734   : > { %v3791_v41 = vadd.f32 %v5473_v38, %v6522_v7  ;;  %v3785_v4 = vpop.f32.mrb[55].mxu1 }
 0x735   : > { %v3786_v50 = vadd.f32 %v6522_v7, %v3785_v4 }
 0x736   : > { %v6626_v2 = vadd.f32 %v3791_v41, %v7233_v3 }
 0x737   : > { %v6630_v16 = vadd.f32 %v3786_v50, %v7234_v40 }
 0x738   : > { %v3855_v19 = vsel %vm774_vm2, %v6626_v2, 0.0 }
 0x739   : > { %3856 = vadd.xlane.f32.xlu0 %v3855_v19  ;;  %v3852_v18 = vsel %vm774_vm2, %v6630_v16, 0.0 }
 0x73a   : > { %3853 = vadd.xlane.f32.xlu1 %v3852_v18 }
 0x77c   : > { %v3815_v11 = vpop.xlane.xlu1 %3814 }
 0x77d   : > { %v3860_v47 = vmul.f32 0.03125, %v3815_v11  ;;  %v3812_v42 = vpop.xlane.xlu0 %3811 }
 0x77e   : > { %v3859_v7 = vmul.f32 0.03125, %v3812_v42 }
 0x77f   : > { %v6637_v44 = vsub.f32 %v6528_v61, %v3860_v47 }
 0x780   : > { %v6640_v39 = vsub.f32 %v6532_v48, %v3859_v7 }
 0x781   : > { %v3892_v46 = vmul.f32 %v6637_v44, %v6637_v44 }
 0x782   : > { %v3891_v21 = vmul.f32 %v6640_v39, %v6640_v39 }
 0x783   : > { %v3910_v22 = vsel %vm774_vm2, %v3892_v46, 0.0 }
 0x784   : > { %3911 = vadd.xlane.f32.xlu0 %v3910_v22  ;;  %v3907_v20 = vsel %vm774_vm2, %v3891_v21, 0.0 }
 0x785   : > { %3908 = vadd.xlane.f32.xlu1 %v3907_v20 }
 0x786   : > { %v3818_v23 = vpop.xlane.xlu0 %3817 }
 0x787   : > { %v3861_v31 = vmul.f32 0.03125, %v3818_v23 }
 0x789   : > { %v6649_v61 = vsub.f32 %v6542_v17, %v3861_v31 }
 0x78a   : > { %v3824_v25 = vpop.xlane.xlu1 %3823  ;;  %v3821_v48 = vpop.xlane.xlu0 %3820 }
 0x78b   : > { %v3863_v51 = vmul.f32 0.03125, %v3824_v25  ;;  %v3862_v45 = vmul.f32 0.03125, %v3821_v48  ;;  %v3893_v56 = vmul.f32 %v6649_v61, %v6649_v61  ;;  %v4061_v48 = vld [vmem:[%s7212_s6 + $0x10] sm:$0xff] }
 0x78d   : > { %v6654_v34 = vsub.f32 %v6554_v0, %v3863_v51  ;;  %v6657_v24 = vsub.f32 %v6546_v54, %v3862_v45  ;;  %v3913_v27 = vsel %vm774_vm2, %v3893_v56, 0.0 }
 0x78e   : > { %v3830_v29 = vpop.xlane.xlu1 %3829  ;;  %3914 = vadd.xlane.f32.xlu1 %v3913_v27  ;;  %v3827_v30 = vpop.xlane.xlu0 %3826 }
 0x78f   : > { %v3865_v17 = vmul.f32 0.03125, %v3830_v29  ;;  %v3864_v35 = vmul.f32 0.03125, %v3827_v30  ;;  %v3895_v53 = vmul.f32 %v6654_v34, %v6654_v34  ;;  %v3894_v14 = vmul.f32 %v6657_v24, %v6657_v24 }
 0x791   : > { %v6665_v57 = vsub.f32 %v6568_v26, %v3865_v17  ;;  %v6668_v0 = vsub.f32 %v6564_v63, %v3864_v35  ;;  %v3919_v54 = vsel %vm774_vm2, %v3895_v53, 0.0  ;;  %v3916_v28 = vsel %vm774_vm2, %v3894_v14, 0.0 }
 0x792   : > { %v3836_v10 = vpop.xlane.xlu1 %3835  ;;  %3920 = vadd.xlane.f32.xlu1 %v3919_v54  ;;  %3917 = vadd.xlane.f32.xlu0 %v3916_v28  ;;  %v3833_v33 = vpop.xlane.xlu0 %3832 }
 0x793   : > { %v3867_v58 = vmul.f32 0.03125, %v3836_v10  ;;  %v3866_v32 = vmul.f32 0.03125, %v3833_v33  ;;  %v3897_v15 = vmul.f32 %v6665_v57, %v6665_v57  ;;  %v3896_v26 = vmul.f32 %v6668_v0, %v6668_v0  ;;  %v4281_v10 = vld [vmem:[%s7214_s8 + $0x10] sm:$0xff] }
 0x795   : > { %v6677_v52 = vsub.f32 %v6582_v8, %v3867_v58  ;;  %v6680_v63 = vsub.f32 %v6578_v6, %v3866_v32  ;;  %v3925_v59 = vsel %vm774_vm2, %v3897_v15, 0.0  ;;  %v3922_v55 = vsel %vm774_vm2, %v3896_v26, 0.0  ;;  %v4282_v58 = vld [vmem:[%s7214_s8 + $0x18] sm:$0xff]  ;;  %v4283_v15 = vld [vmem:[%s7214_s8 + $0x20] sm:$0xff]  ;;  %v4284_v26 = vld [vmem:[%s7214_s8 + $0x28] sm:$0xff] }
 0x796   : > { %v3842_v5 = vpop.xlane.xlu1 %3841  ;;  %3926 = vadd.xlane.f32.xlu1 %v3925_v59  ;;  %3923 = vadd.xlane.f32.xlu0 %v3922_v55  ;;  %v3839_v37 = vpop.xlane.xlu0 %3838  ;;  %v5606_v32 = vpack.c.bf16 %v4282_v58, %v4281_v10  ;;  %v5610_v59 = vpack.c.bf16 %v4284_v26, %v4283_v15 }
 0x797   : > { %v3869_v49 = vmul.f32 0.03125, %v3842_v5  ;;  %v3868_v62 = vmul.f32 0.03125, %v3839_v37  ;;  %v3899_v60 = vmul.f32 %v6677_v52, %v6677_v52  ;;  %v3898_v8 = vmul.f32 %v6680_v63, %v6680_v63 }
 0x799   : > { %v6689_v36 = vsub.f32 %v6596_v1, %v3869_v49  ;;  %v6692_v6 = vsub.f32 %v6586_v12, %v3868_v62  ;;  %v3931_v38 = vsel %vm774_vm2, %v3899_v60, 0.0  ;;  %v3928_v41 = vsel %vm774_vm2, %v3898_v8, 0.0 }
 0x79a   : > { %v3848_v4 = vpop.xlane.xlu1 %3847  ;;  %3932 = vadd.xlane.f32.xlu1 %v3931_v38  ;;  %3929 = vadd.xlane.f32.xlu0 %v3928_v41  ;;  %v3845_v50 = vpop.xlane.xlu0 %3844 }
 0x79b   : > { %v3871_v3 = vmul.f32 0.03125, %v3848_v4  ;;  %v3870_v40 = vmul.f32 0.03125, %v3845_v50  ;;  %v3901_v19 = vmul.f32 %v6689_v36, %v6689_v36  ;;  %v3900_v1 = vmul.f32 %v6692_v6, %v6692_v6  ;;  %v6765_v50 = vld [vmem:[%s7215_s9 + $0x3] ss:$0 sm:$0xff] }
 0x79d   : > { %v6701_v18 = vsub.f32 %v6610_v9, %v3871_v3  ;;  %v6704_v12 = vsub.f32 %v6606_v13, %v3870_v40  ;;  %v3937_v11 = vsel %vm774_vm2, %v3901_v19, 0.0  ;;  %v3934_v47 = vsel %vm774_vm2, %v3900_v1, 0.0  ;;  %v4059_v9 = vld [vmem:[%s7212_s6] sm:$0xff]  ;;  %v4060_v13 = vld [vmem:[%s7212_s6 + $0x8] sm:$0xff] }
 0x79e   : > { %3938 = vadd.xlane.f32.xlu1 %v3937_v11  ;;  %3935 = vadd.xlane.f32.xlu0 %v3934_v47  ;;  %v3851_v42 = vpop.xlane.xlu0 %3850  ;;  %v5594_v31 = vpack.c.bf16 %v4060_v13, %v4059_v9 }
 0x79f   : > { %v3872_v7 = vmul.f32 0.03125, %v3851_v42  ;;  %v3903_v46 = vmul.f32 %v6701_v18, %v6701_v18  ;;  %v3902_v21 = vmul.f32 %v6704_v12, %v6704_v12 }
 0x7a0   : > { %5595 = vmatprep.subr.bf16.mxu0 %v5594_v31 }
 0x7a1   : > { %v6719_v22 = vsub.f32 %v6618_v43, %v3872_v7  ;;  %v3943_v20 = vsel %vm774_vm2, %v3903_v46, 0.0  ;;  %v3940_v23 = vsel %vm774_vm2, %v3902_v21, 0.0  ;;  %5597 = vmatpush3.bf16.msra.mxu0 %v5594_v31  ;;  %v4062_v43 = vld [vmem:[%s7212_s6 + $0x18] sm:$0xff]  ;;  %v6772_v7 = vld [vmem:[%s7215_s9 + $0x4] ss:$0 sm:$0xff] }
 0x7a2   : > { %3944 = vadd.xlane.f32.xlu1 %v3943_v20  ;;  %3941 = vadd.xlane.f32.xlu0 %v3940_v23  ;;  %v5598_v45 = vpack.c.bf16 %v4062_v43, %v4061_v48 }
 0x7a3   : > { %v3904_v25 = vmul.f32 %v6719_v22, %v6719_v22 }
 0x7a4   : > { %5599 = vmatprep.subr.bf16.mxu0 %v5598_v45 }
 0x7a5   : > { %v3946_v51 = vsel %vm774_vm2, %v3904_v25, 0.0  ;;  %5601 = vmatpush3.bf16.msra.mxu0 %v5598_v45 }
 0x7a6   : > { %3947 = vadd.xlane.f32.xlu0 %v3946_v51 }
 0x7c6   : > { %v3857_v56 = vpop.xlane.xlu0 %3856 }
 0x7c7   : > { %v3874_v27 = vmul.f32 0.03125, %v3857_v56  ;;  %v3854_v29 = vpop.xlane.xlu1 %3853 }
 0x7c8   : > { %v3873_v30 = vmul.f32 0.03125, %v3854_v29 }
 0x7c9   : > { %v6733_v17 = vsub.f32 %v6626_v2, %v3874_v27  ;;  %v4279_v2 = vld [vmem:[%s7214_s8] sm:$0xff] }
 0x7ca   : > { %v6736_v35 = vsub.f32 %v6630_v16, %v3873_v30  ;;  %v4280_v16 = vld [vmem:[%s7214_s8 + $0x8] sm:$0xff] }
 0x7cb   : > { %v3906_v53 = vmul.f32 %v6733_v17, %v6733_v17  ;;  %v5602_v33 = vpack.c.bf16 %v4280_v16, %v4279_v2 }
 0x7cc   : > { %v3905_v14 = vmul.f32 %v6736_v35, %v6736_v35 }
 0x7cd   : > { %v3952_v54 = vsel %vm774_vm2, %v3906_v53, 0.0  ;;  %5603 = vmatprep.subr.bf16.mxu1 %v5602_v33 }
 0x7ce   : > { %3953 = vadd.xlane.f32.xlu0 %v3952_v54  ;;  %v3949_v28 = vsel %vm774_vm2, %v3905_v14, 0.0  ;;  %5605 = vmatpush3.bf16.msra.mxu1 %v5602_v33 }
 0x7cf   : > { %3950 = vadd.xlane.f32.xlu1 %v3949_v28  ;;  %5607 = vmatprep.subr.bf16.mxu1 %v5606_v32 }
 0x7d2   : > { %5609 = vmatpush3.bf16.msra.mxu1 %v5606_v32 }
 0x7d3   : > { %5611 = vmatprep.subr.bf16.mxu1 %v5610_v59 }
 0x7d6   : > { %5613 = vmatpush3.bf16.msra.mxu1 %v5610_v59 }
 0x811   : > { %v3912_v55 = vpop.xlane.xlu0 %3911 }
 0x812   : > { %v3956_v5 = vmul.f32 0.03125, %v3912_v55  ;;  %v3909_v37 = vpop.xlane.xlu1 %3908 }
 0x813   : > { %v3955_v49 = vmul.f32 0.03125, %v3909_v37 }
 0x814   : > { %v3972_v62 = vadd.f32 1e-05, %v3956_v5 }
 0x815   : > { %v3971_v60 = vadd.f32 1e-05, %v3955_v49 }
 0x816   : > { %5698 = vrsqrt.f32 %v3972_v62 }
 0x817   : > { %5700 = vrsqrt.f32 %v3971_v60 }
 0x81b   : > { %v3915_v8 = vpop.xlane.xlu1 %3914 }
 0x81c   : > { %v3957_v38 = vmul.f32 0.03125, %v3915_v8 }
 0x81e   : > { %v3973_v41 = vadd.f32 1e-05, %v3957_v38 }
 0x81f   : > { %v3921_v3 = vpop.xlane.xlu1 %3920  ;;  %v3918_v40 = vpop.xlane.xlu0 %3917 }
 0x820   : > { %v5699_v4 = vpop.eup %5698  ;;  %5702 = vrsqrt.f32 %v3973_v41  ;;  %v3959_v11 = vmul.f32 0.03125, %v3921_v3  ;;  %v3958_v47 = vmul.f32 0.03125, %v3918_v40 }
 0x821   : > { %v5701_v19 = vpop.eup %5700  ;;  %v4004_v1 = vmul.f32 %v5699_v4, %v6637_v44 }
 0x822   : > { %v4003_v42 = vmul.f32 %v5701_v19, %v6640_v39  ;;  %v3975_v21 = vadd.f32 1e-05, %v3959_v11  ;;  %v3974_v9 = vadd.f32 1e-05, %v3958_v47 }
 0x823   : > { %v4024_v46 = vmul.f32 %v6765_v50, %v4004_v1  ;;  %v3927_v13 = vpop.xlane.xlu1 %3926  ;;  %v3924_v20 = vpop.xlane.xlu0 %3923 }
 0x824   : > { %v4023_v23 = vmul.f32 %v6765_v50, %v4003_v42  ;;  %5704 = vrsqrt.f32 %v3975_v21  ;;  %v3961_v44 = vmul.f32 0.03125, %v3927_v13  ;;  %v3960_v31 = vmul.f32 0.03125, %v3924_v20 }
 0x825   : > { %5706 = vrsqrt.f32 %v3974_v9  ;;  %v6780_v39 = vadd.f32 %v6772_v7, %v4024_v46 }
 0x826   : > { %v6777_v25 = vadd.f32 %v6772_v7, %v4023_v23  ;;  %v3977_v48 = vadd.f32 1e-05, %v3961_v44  ;;  %v3976_v43 = vadd.f32 1e-05, %v3960_v31 }
 0x827   : > { %v3933_v51 = vpop.xlane.xlu1 %3932  ;;  %v3930_v45 = vpop.xlane.xlu0 %3929 }
 0x828   : > { %5482 = vmatprep.mubr.msk.f32.mxu0 %vm774_vm2, %v6777_v25  ;;  %5708 = vrsqrt.f32 %v3977_v48  ;;  %v3963_v56 = vmul.f32 0.03125, %v3933_v51  ;;  %v3962_v27 = vmul.f32 0.03125, %v3930_v45 }
 0x829   : > { %5483 = vmatmul.mubr.msk.f32.vlgmr.msra.gmra.mrb[72].mxu0 %vm774_vm2, %v6780_v39  ;;  %5710 = vrsqrt.f32 %v3976_v43 }
 0x82a   : > { %v5703_v29 = vpop.eup %5702  ;;  %v3979_v30 = vadd.f32 1e-05, %v3963_v56  ;;  %v3978_v53 = vadd.f32 1e-05, %v3962_v27 }
 0x82b   : > { %v3939_v14 = vpop.xlane.xlu1 %3938  ;;  %v3936_v54 = vpop.xlane.xlu0 %3935  ;;  %v4005_v28 = vmul.f32 %v5703_v29, %v6649_v61 }
 0x82c   : > { %5712 = vrsqrt.f32 %v3979_v30  ;;  %v3965_v2 = vmul.f32 0.03125, %v3939_v14  ;;  %v3964_v16 = vmul.f32 0.03125, %v3936_v54 }
 0x82d   : > { %5714 = vrsqrt.f32 %v3978_v53  ;;  %v4025_v10 = vmul.f32 %v6765_v50, %v4005_v28 }
 0x82e   : > { %v5705_v33 = vpop.eup %5704  ;;  %v3981_v58 = vadd.f32 1e-05, %v3965_v2  ;;  %v3980_v32 = vadd.f32 1e-05, %v3964_v16 }
 0x82f   : > { %v5707_v15 = vpop.eup %5706  ;;  %v3945_v26 = vpop.xlane.xlu1 %3944  ;;  %v6789_v55 = vadd.f32 %v6772_v7, %v4025_v10  ;;  %v4007_v5 = vmul.f32 %v5705_v33, %v6654_v34 }
 0x830   : > { %v3942_v59 = vpop.xlane.xlu0 %3941  ;;  %5716 = vrsqrt.f32 %v3981_v58  ;;  %v3967_v37 = vmul.f32 0.03125, %v3945_v26  ;;  %v4006_v49 = vmul.f32 %v5707_v15, %v6657_v24 }
 0x831   : > { %v3966_v61 = vmul.f32 0.03125, %v3942_v59  ;;  %5718 = vrsqrt.f32 %v3980_v32  ;;  %5485 = vmatprep.mubr.msk.f32.mxu0 %vm774_vm2, %v6789_v55  ;;  %v4027_v62 = vmul.f32 %v6765_v50, %v4007_v5 }
 0x832   : > { %v5709_v60 = vpop.eup %5708  ;;  %v3983_v8 = vadd.f32 1e-05, %v3967_v37  ;;  %v4026_v41 = vmul.f32 %v6765_v50, %v4006_v49 }
 0x833   : > { %v3982_v38 = vadd.f32 1e-05, %v3966_v61  ;;  %v5711_v4 = vpop.eup %5710  ;;  %v6798_v34 = vadd.f32 %v6772_v7, %v4027_v62  ;;  %v4009_v40 = vmul.f32 %v5709_v60, %v6665_v57 }
 0x834   : > { %v3948_v3 = vpop.xlane.xlu0 %3947  ;;  %5720 = vrsqrt.f32 %v3983_v8  ;;  %v6802_v19 = vadd.f32 %v6772_v7, %v4026_v41  ;;  %v4008_v1 = vmul.f32 %v5711_v4, %v6668_v0 }
 0x835   : > { %v3968_v24 = vmul.f32 0.03125, %v3948_v3  ;;  %5722 = vrsqrt.f32 %v3982_v38  ;;  %v4029_v11 = vmul.f32 %v6765_v50, %v4009_v40 }
 0x836   : > { %v5713_v47 = vpop.eup %5712  ;;  %5486 = vmatmul.mubr.msk.f32.gmra.mrb[74].mxu0 %vm774_vm2, %v6802_v19  ;;  %v4028_v46 = vmul.f32 %v6765_v50, %v4008_v1 }
 0x837   : > { %v3984_v42 = vadd.f32 1e-05, %v3968_v24  ;;  %v5715_v21 = vpop.eup %5714  ;;  %5488 = vmatprep.mubr.msk.f32.mxu0 %vm774_vm2, %v6798_v34  ;;  %v6812_v57 = vadd.f32 %v6772_v7, %v4029_v11  ;;  %v4011_v9 = vmul.f32 %v5713_v47, %v6677_v52 }
 0x838   : > { %v6816_v0 = vadd.f32 %v6772_v7, %v4028_v46  ;;  %v4010_v13 = vmul.f32 %v5715_v21, %v6680_v63 }
 0x839   : > { %5724 = vrsqrt.f32 %v3984_v42  ;;  %v4031_v20 = vmul.f32 %v6765_v50, %v4011_v9 }
 0x83a   : > { %v5717_v23 = vpop.eup %5716  ;;  %5489 = vmatmul.mubr.msk.f32.gmra.mrb[76].mxu0 %vm774_vm2, %v6816_v0  ;;  %v4030_v44 = vmul.f32 %v6765_v50, %v4010_v13 }
 0x83b   : > { %v5719_v31 = vpop.eup %5718  ;;  %5491 = vmatprep.mubr.msk.f32.mxu0 %vm774_vm2, %v6812_v57  ;;  %v6826_v52 = vadd.f32 %v6772_v7, %v4031_v20  ;;  %v4013_v48 = vmul.f32 %v5717_v23, %v6689_v36 }
 0x83c   : > { %v6830_v43 = vadd.f32 %v6772_v7, %v4030_v44  ;;  %v4012_v63 = vmul.f32 %v5719_v31, %v6692_v6 }
 0x83d   : > { %v4033_v51 = vmul.f32 %v6765_v50, %v4013_v48 }
 0x83e   : > { %v5721_v45 = vpop.eup %5720  ;;  %5492 = vmatmul.mubr.msk.f32.gmra.mrb[78].mxu0 %vm774_vm2, %v6830_v43  ;;  %v4032_v56 = vmul.f32 %v6765_v50, %v4012_v63 }
 0x83f   : > { %v5723_v27 = vpop.eup %5722  ;;  %5494 = vmatprep.mubr.msk.f32.mxu0 %vm774_vm2, %v6826_v52  ;;  %v6840_v29 = vadd.f32 %v6772_v7, %v4033_v51  ;;  %v4015_v36 = vmul.f32 %v5721_v45, %v6701_v18 }
 0x840   : > { %v6844_v30 = vadd.f32 %v6772_v7, %v4032_v56  ;;  %v4014_v6 = vmul.f32 %v5723_v27, %v6704_v12 }
 0x841   : > { %v4035_v53 = vmul.f32 %v6765_v50, %v4015_v36 }
 0x842   : > { %5495 = vmatmul.mubr.msk.f32.gmra.mrb[80].mxu0 %vm774_vm2, %v6844_v30  ;;  %v4034_v54 = vmul.f32 %v6765_v50, %v4014_v6 }
 0x843   : > { %v5725_v14 = vpop.eup %5724  ;;  %5497 = vmatprep.mubr.msk.f32.mxu0 %vm774_vm2, %v6840_v29  ;;  %v6854_v28 = vadd.f32 %v6772_v7, %v4035_v53 }
 0x844   : > { %v4016_v18 = vmul.f32 %v5725_v14, %v6719_v22  ;;  %v6858_v2 = vadd.f32 %v6772_v7, %v4034_v54 }
 0x846   : > { %v4036_v12 = vmul.f32 %v6765_v50, %v4016_v18  ;;  %5498 = vmatmul.mubr.msk.f32.gmra.mrb[82].mxu0 %vm774_vm2, %v6858_v2 }
 0x847   : > { %5500 = vmatprep.mubr.msk.f32.mxu0 %vm774_vm2, %v6854_v28 }
 0x848   : > { %v6866_v16 = vadd.f32 %v6772_v7, %v4036_v12 }
 0x84a   : > { %5501 = vmatmul.mubr.msk.f32.gmra.mrb[84].mxu0 %vm774_vm2, %v6866_v16 }
 0x85b   : > { %v3954_v10 = vpop.xlane.xlu0 %3953 }
 0x85c   : > { %v3970_v33 = vmul.f32 0.03125, %v3954_v10  ;;  %v3951_v22 = vpop.xlane.xlu1 %3950 }
 0x85d   : > { %v3969_v58 = vmul.f32 0.03125, %v3951_v22 }
 0x85e   : > { %v3986_v32 = vadd.f32 1e-05, %v3970_v33 }
 0x85f   : > { %v3985_v15 = vadd.f32 1e-05, %v3969_v58 }
 0x860   : > { %5726 = vrsqrt.f32 %v3986_v32 }
 0x861   : > { %5728 = vrsqrt.f32 %v3985_v15 }
 0x86a   : > { %v5727_v26 = vpop.eup %5726 }
 0x86b   : > { %v5729_v59 = vpop.eup %5728  ;;  %v4018_v5 = vmul.f32 %v5727_v26, %v6733_v17  ;;  %v4285_v17 = vld [vmem:[%s7214_s8 + $0x30] sm:$0xff] }
 0x86c   : > { %v4017_v37 = vmul.f32 %v5729_v59, %v6736_v35  ;;  %v4286_v35 = vld [vmem:[%s7214_s8 + $0x38] sm:$0xff] }
 0x86d   : > { %v4038_v61 = vmul.f32 %v6765_v50, %v4018_v5 }
 0x86e   : > { %v4037_v49 = vmul.f32 %v6765_v50, %v4017_v37  ;;  %v5614_v50 = vpack.c.bf16 %v4286_v35, %v4285_v17 }
 0x86f   : > { %v6878_v60 = vadd.f32 %v6772_v7, %v4038_v61 }
 0x870   : > { %v6875_v62 = vadd.f32 %v6772_v7, %v4037_v49  ;;  %5615 = vmatprep.subr.bf16.mxu1 %v5614_v50  ;;  %v4931_v7 = vld [vmem:[%s7213_s7] ss:$0 sm:$0xff] }
 0x871   : > { %5617 = vmatpush3.bf16.msra.mxu1 %v5614_v50 }
 0x872   : > { %5503 = vmatprep.mubr.msk.f32.mxu0 %vm774_vm2, %v6875_v62 }
 0x873   : > { %5504 = vmatmul.mubr.msk.f32.gmra.mrb[86].mxu0 %vm774_vm2, %v6878_v60 }
 0x8fc   : > { %v5484_v8 = vpop.f32.mrb[72].mxu0 }
 0x8fd   : > { %v4190_v38 = vadd.f32 %v5484_v8, %v4931_v7  ;;  %v4184_v41 = vpop.f32.mrb[73].mxu0 }
 0x8fe   : > { %v4185_v4 = vadd.f32 %v4931_v7, %v4184_v41 }
 0x8ff   : > { %v4264_v40 = vmax.f32 %v4190_v38, 0.0  ;;  %v6912_v38 = vld [vmem:[%s7215_s9 + $0x2] ss:$0 sm:$0xff] }
 0x900   : > { %v4263_v3 = vmax.f32 %v4185_v4, 0.0 }
 0x902   : > { %5522 = vmatprep.mubr.msk.f32.mxu1 %vm4291_vm5, %v4263_v3 }
 0x903   : > { %5523 = vmatmul.mubr.msk.f32.vlgmr.msra.gmra.mrb[56].mxu1 %vm4291_vm5, %v4264_v40 }
 0x909   : > { %v5487_v24 = vpop.f32.mrb[74].mxu0 }
 0x90a   : > { %v4200_v1 = vadd.f32 %v5487_v24, %v4931_v7  ;;  %v4194_v11 = vpop.f32.mrb[75].mxu0 }
 0x90b   : > { %v4195_v47 = vadd.f32 %v4931_v7, %v4194_v11 }
 0x90c   : > { %v4266_v21 = vmax.f32 %v4200_v1, 0.0 }
 0x90d   : > { %v4265_v42 = vmax.f32 %v4195_v47, 0.0  ;;  %v5490_v46 = vpop.f32.mrb[76].mxu0 }
 0x90e   : > { %v4210_v9 = vadd.f32 %v5490_v46, %v4931_v7  ;;  %v4204_v13 = vpop.f32.mrb[77].mxu0 }
 0x90f   : > { %v4205_v20 = vadd.f32 %v4931_v7, %v4204_v13  ;;  %5525 = vmatprep.mubr.msk.f32.mxu1 %vm4291_vm5, %v4265_v42 }
 0x910   : > { %5526 = vmatmul.mubr.msk.f32.gmra.mrb[58].mxu1 %vm4291_vm5, %v4266_v21  ;;  %v4268_v31 = vmax.f32 %v4210_v9, 0.0 }
 0x911   : > { %v4267_v23 = vmax.f32 %v4205_v20, 0.0  ;;  %v5493_v44 = vpop.f32.mrb[78].mxu0 }
 0x912   : > { %v4220_v48 = vadd.f32 %v5493_v44, %v4931_v7  ;;  %v4214_v63 = vpop.f32.mrb[79].mxu0 }
 0x913   : > { %v4215_v51 = vadd.f32 %v4931_v7, %v4214_v63  ;;  %5528 = vmatprep.mubr.msk.f32.mxu1 %vm4291_vm5, %v4267_v23 }
 0x914   : > { %5529 = vmatmul.mubr.msk.f32.gmra.mrb[60].mxu1 %vm4291_vm5, %v4268_v31  ;;  %v4270_v27 = vmax.f32 %v4220_v48, 0.0 }
 0x915   : > { %v4269_v45 = vmax.f32 %v4215_v51, 0.0  ;;  %v5496_v56 = vpop.f32.mrb[80].mxu0 }
 0x916   : > { %v4230_v36 = vadd.f32 %v5496_v56, %v4931_v7  ;;  %v4224_v6 = vpop.f32.mrb[81].mxu0 }
 0x917   : > { %v4225_v53 = vadd.f32 %v4931_v7, %v4224_v6  ;;  %5531 = vmatprep.mubr.msk.f32.mxu1 %vm4291_vm5, %v4269_v45 }
 0x918   : > { %5532 = vmatmul.mubr.msk.f32.gmra.mrb[62].mxu1 %vm4291_vm5, %v4270_v27  ;;  %v4272_v18 = vmax.f32 %v4230_v36, 0.0 }
 0x919   : > { %v4271_v14 = vmax.f32 %v4225_v53, 0.0  ;;  %v5499_v54 = vpop.f32.mrb[82].mxu0 }
 0x91a   : > { %v4240_v12 = vadd.f32 %v5499_v54, %v4931_v7  ;;  %v4234_v10 = vpop.f32.mrb[83].mxu0 }
 0x91b   : > { %v4235_v33 = vadd.f32 %v4931_v7, %v4234_v10  ;;  %5534 = vmatprep.mubr.msk.f32.mxu1 %vm4291_vm5, %v4271_v14 }
 0x91c   : > { %5535 = vmatmul.mubr.msk.f32.gmra.mrb[64].mxu1 %vm4291_vm5, %v4272_v18  ;;  %v4274_v32 = vmax.f32 %v4240_v12, 0.0 }
 0x91d   : > { %v4273_v22 = vmax.f32 %v4235_v33, 0.0  ;;  %v5502_v58 = vpop.f32.mrb[84].mxu0 }
 0x91e   : > { %v4250_v15 = vadd.f32 %v5502_v58, %v4931_v7  ;;  %v4244_v26 = vpop.f32.mrb[85].mxu0 }
 0x91f   : > { %v4245_v59 = vadd.f32 %v4931_v7, %v4244_v26  ;;  %5537 = vmatprep.mubr.msk.f32.mxu1 %vm4291_vm5, %v4273_v22 }
 0x920   : > { %5538 = vmatmul.mubr.msk.f32.gmra.mrb[66].mxu1 %vm4291_vm5, %v4274_v32  ;;  %v4276_v37 = vmax.f32 %v4250_v15, 0.0 }
 0x921   : > { %v4275_v5 = vmax.f32 %v4245_v59, 0.0 }
 0x923   : > { %5540 = vmatprep.mubr.msk.f32.mxu1 %vm4291_vm5, %v4275_v5 }
 0x924   : > { %5541 = vmatmul.mubr.msk.f32.gmra.mrb[68].mxu1 %vm4291_vm5, %v4276_v37 }
 0x946   : > { %v5505_v61 = vpop.f32.mrb[86].mxu0 }
 0x947   : > { %v4260_v49 = vadd.f32 %v5505_v61, %v4931_v7  ;;  %v4254_v17 = vpop.f32.mrb[87].mxu0 }
 0x948   : > { %v4255_v35 = vadd.f32 %v4931_v7, %v4254_v17 }
 0x949   : > { %v4278_v8 = vmax.f32 %v4260_v49, 0.0 }
 0x94a   : > { %v4277_v50 = vmax.f32 %v4255_v35, 0.0 }
 0x94c   : > { %5543 = vmatprep.mubr.msk.f32.mxu1 %vm4291_vm5, %v4277_v50 }
 0x94d   : > { %5544 = vmatmul.mubr.msk.f32.gmra.mrb[70].mxu1 %vm4291_vm5, %v4278_v8 }
 0x9d6   : > { %v5524_v41 = vpop.f32.mrb[56].mxu1 }
 0x9d7   : > { %v4412_v4 = vadd.f32 %v5524_v41, %v6912_v38  ;;  %v4406_v3 = vpop.f32.mrb[57].mxu1 }
 0x9d8   : > { %v4407_v40 = vadd.f32 %v6912_v38, %v4406_v3 }
 0x9d9   : > { %v6917_v24 = vadd.f32 %v4412_v4, %v6780_v39 }
 0x9da   : > { %v6920_v7 = vadd.f32 %v4407_v40, %v6777_v25 }
 0x9db   : > { %v4504_v1 = vsel %vm774_vm2, %v6917_v24, 0.0 }
 0x9dc   : > { %4505 = vadd.xlane.f32.xlu0 %v4504_v1  ;;  %v4501_v11 = vsel %vm774_vm2, %v6920_v7, 0.0 }
 0x9dd   : > { %4502 = vadd.xlane.f32.xlu1 %v4501_v11 }
 0x9e3   : > { %v5527_v47 = vpop.f32.mrb[58].mxu1 }
 0x9e4   : > { %v4422_v42 = vadd.f32 %v5527_v47, %v6912_v38  ;;  %v4416_v46 = vpop.f32.mrb[59].mxu1 }
 0x9e5   : > { %v4417_v21 = vadd.f32 %v6912_v38, %v4416_v46 }
 0x9e6   : > { %v6929_v39 = vadd.f32 %v4422_v42, %v6802_v19 }
 0x9e7   : > { %v5530_v9 = vpop.f32.mrb[60].mxu1  ;;  %v6932_v25 = vadd.f32 %v4417_v21, %v6789_v55 }
 0x9e8   : > { %v4432_v13 = vadd.f32 %v5530_v9, %v6912_v38  ;;  %v4426_v20 = vpop.f32.mrb[61].mxu1  ;;  %v4510_v23 = vsel %vm774_vm2, %v6929_v39, 0.0 }
 0x9e9   : > { %v4427_v44 = vadd.f32 %v6912_v38, %v4426_v20  ;;  %4511 = vadd.xlane.f32.xlu0 %v4510_v23  ;;  %v4507_v31 = vsel %vm774_vm2, %v6932_v25, 0.0 }
 0x9ea   : > { %v6941_v48 = vadd.f32 %v4432_v13, %v6816_v0  ;;  %4508 = vadd.xlane.f32.xlu1 %v4507_v31 }
 0x9eb   : > { %v6944_v19 = vadd.f32 %v4427_v44, %v6798_v34  ;;  %v5533_v55 = vpop.f32.mrb[62].mxu1 }
 0x9ec   : > { %v4442_v63 = vadd.f32 %v5533_v55, %v6912_v38  ;;  %v4436_v51 = vpop.f32.mrb[63].mxu1  ;;  %v4516_v45 = vsel %vm774_vm2, %v6941_v48, 0.0 }
 0x9ed   : > { %v4437_v56 = vadd.f32 %v6912_v38, %v4436_v51  ;;  %4517 = vadd.xlane.f32.xlu0 %v4516_v45  ;;  %v4513_v27 = vsel %vm774_vm2, %v6944_v19, 0.0 }
 0x9ee   : > { %v6953_v0 = vadd.f32 %v4442_v63, %v6830_v43  ;;  %4514 = vadd.xlane.f32.xlu1 %v4513_v27 }
 0x9ef   : > { %v6956_v34 = vadd.f32 %v4437_v56, %v6812_v57  ;;  %v5536_v36 = vpop.f32.mrb[64].mxu1 }
 0x9f0   : > { %v4452_v6 = vadd.f32 %v5536_v36, %v6912_v38  ;;  %v4446_v53 = vpop.f32.mrb[65].mxu1  ;;  %v4522_v14 = vsel %vm774_vm2, %v6953_v0, 0.0 }
 0x9f1   : > { %v4447_v54 = vadd.f32 %v6912_v38, %v4446_v53  ;;  %4523 = vadd.xlane.f32.xlu0 %v4522_v14  ;;  %v4519_v18 = vsel %vm774_vm2, %v6956_v34, 0.0 }
 0x9f2   : > { %v6965_v43 = vadd.f32 %v4452_v6, %v6844_v30  ;;  %4520 = vadd.xlane.f32.xlu1 %v4519_v18 }
 0x9f3   : > { %v6968_v57 = vadd.f32 %v4447_v54, %v6826_v52  ;;  %v5539_v12 = vpop.f32.mrb[66].mxu1 }
 0x9f4   : > { %v4462_v10 = vadd.f32 %v5539_v12, %v6912_v38  ;;  %v4456_v33 = vpop.f32.mrb[67].mxu1  ;;  %v4528_v22 = vsel %vm774_vm2, %v6965_v43, 0.0 }
 0x9f5   : > { %v4457_v58 = vadd.f32 %v6912_v38, %v4456_v33  ;;  %4529 = vadd.xlane.f32.xlu0 %v4528_v22  ;;  %v4525_v32 = vsel %vm774_vm2, %v6968_v57, 0.0 }
 0x9f6   : > { %v6977_v30 = vadd.f32 %v4462_v10, %v6858_v2  ;;  %4526 = vadd.xlane.f32.xlu1 %v4525_v32 }
 0x9f7   : > { %v6980_v52 = vadd.f32 %v4457_v58, %v6840_v29  ;;  %v5542_v15 = vpop.f32.mrb[68].mxu1 }
 0x9f8   : > { %v4472_v26 = vadd.f32 %v5542_v15, %v6912_v38  ;;  %v4466_v59 = vpop.f32.mrb[69].mxu1  ;;  %v4534_v5 = vsel %vm774_vm2, %v6977_v30, 0.0 }
 0x9f9   : > { %v4467_v37 = vadd.f32 %v6912_v38, %v4466_v59  ;;  %4535 = vadd.xlane.f32.xlu0 %v4534_v5  ;;  %v4531_v61 = vsel %vm774_vm2, %v6980_v52, 0.0 }
 0x9fa   : > { %v6989_v2 = vadd.f32 %v4472_v26, %v6866_v16  ;;  %4532 = vadd.xlane.f32.xlu1 %v4531_v61 }
 0x9fb   : > { %v6992_v29 = vadd.f32 %v4467_v37, %v6854_v28 }
 0x9fc   : > { %v4540_v49 = vsel %vm774_vm2, %v6989_v2, 0.0 }
 0x9fd   : > { %4541 = vadd.xlane.f32.xlu0 %v4540_v49  ;;  %v4537_v17 = vsel %vm774_vm2, %v6992_v29, 0.0 }
 0x9fe   : > { %4538 = vadd.xlane.f32.xlu1 %v4537_v17 }
 0xa20   : > { %v5545_v35 = vpop.f32.mrb[70].mxu1 }
 0xa21   : > { %v4482_v50 = vadd.f32 %v5545_v35, %v6912_v38  ;;  %v4476_v8 = vpop.f32.mrb[71].mxu1 }
 0xa22   : > { %v4477_v41 = vadd.f32 %v6912_v38, %v4476_v8 }
 0xa23   : > { %v7001_v16 = vadd.f32 %v4482_v50, %v6878_v60 }
 0xa24   : > { %v7004_v28 = vadd.f32 %v4477_v41, %v6875_v62 }
 0xa25   : > { %v4546_v4 = vsel %vm774_vm2, %v7001_v16, 0.0 }
 0xa26   : > { %4547 = vadd.xlane.f32.xlu0 %v4546_v4  ;;  %v4543_v3 = vsel %vm774_vm2, %v7004_v28, 0.0 }
 0xa27   : > { %4544 = vadd.xlane.f32.xlu1 %v4543_v3 }
 0xa69   : > { %v4506_v40 = vpop.xlane.xlu0 %4505 }
 0xa6a   : > { %v4550_v1 = vmul.f32 0.03125, %v4506_v40  ;;  %v4503_v11 = vpop.xlane.xlu1 %4502 }
 0xa6b   : > { %v4549_v47 = vmul.f32 0.03125, %v4503_v11 }
 0xa6c   : > { %v7011_v38 = vsub.f32 %v6917_v24, %v4550_v1 }
 0xa6d   : > { %v7014_v60 = vsub.f32 %v6920_v7, %v4549_v47 }
 0xa6e   : > { %v4582_v62 = vmul.f32 %v7011_v38, %v7011_v38 }
 0xa6f   : > { %v4581_v42 = vmul.f32 %v7014_v60, %v7014_v60 }
 0xa70   : > { %v4600_v46 = vsel %vm774_vm2, %v4582_v62, 0.0 }
 0xa71   : > { %4601 = vadd.xlane.f32.xlu0 %v4600_v46  ;;  %v4597_v21 = vsel %vm774_vm2, %v4581_v42, 0.0 }
 0xa72   : > { %4598 = vadd.xlane.f32.xlu1 %v4597_v21 }
 0xa76   : > { %v4512_v9 = vpop.xlane.xlu0 %4511 }
 0xa77   : > { %v4552_v13 = vmul.f32 0.03125, %v4512_v9  ;;  %v4509_v20 = vpop.xlane.xlu1 %4508 }
 0xa78   : > { %v4551_v24 = vmul.f32 0.03125, %v4509_v20 }
 0xa79   : > { %v7023_v23 = vsub.f32 %v6929_v39, %v4552_v13 }
 0xa7a   : > { %v7026_v7 = vsub.f32 %v6932_v25, %v4551_v24  ;;  %v4518_v44 = vpop.xlane.xlu0 %4517 }
 0xa7b   : > { %v4554_v31 = vmul.f32 0.03125, %v4518_v44  ;;  %v4515_v55 = vpop.xlane.xlu1 %4514  ;;  %v4584_v63 = vmul.f32 %v7023_v23, %v7023_v23 }
 0xa7c   : > { %v4553_v51 = vmul.f32 0.03125, %v4515_v55  ;;  %v4583_v45 = vmul.f32 %v7026_v7, %v7026_v7 }
 0xa7d   : > { %v7033_v56 = vsub.f32 %v6941_v48, %v4554_v31  ;;  %v4606_v27 = vsel %vm774_vm2, %v4584_v63, 0.0 }
 0xa7e   : > { %v7037_v39 = vsub.f32 %v6944_v19, %v4553_v51  ;;  %4607 = vadd.xlane.f32.xlu0 %v4606_v27  ;;  %v4524_v25 = vpop.xlane.xlu0 %4523  ;;  %v4603_v36 = vsel %vm774_vm2, %v4583_v45, 0.0 }
 0xa7f   : > { %v4556_v6 = vmul.f32 0.03125, %v4524_v25  ;;  %v4521_v53 = vpop.xlane.xlu1 %4520  ;;  %4604 = vadd.xlane.f32.xlu1 %v4603_v36  ;;  %v4586_v14 = vmul.f32 %v7033_v56, %v7033_v56 }
 0xa80   : > { %v4555_v54 = vmul.f32 0.03125, %v4521_v53  ;;  %v4585_v48 = vmul.f32 %v7037_v39, %v7037_v39 }
 0xa81   : > { %v7045_v18 = vsub.f32 %v6953_v0, %v4556_v6  ;;  %v4612_v19 = vsel %vm774_vm2, %v4586_v14, 0.0 }
 0xa82   : > { %v7049_v12 = vsub.f32 %v6956_v34, %v4555_v54  ;;  %4613 = vadd.xlane.f32.xlu0 %v4612_v19  ;;  %v4530_v10 = vpop.xlane.xlu0 %4529  ;;  %v4609_v33 = vsel %vm774_vm2, %v4585_v48, 0.0  ;;  %v7109_v54 = vld [vmem:[%s7215_s9 + $0x5] ss:$0 sm:$0xff] }
 0xa83   : > { %v4558_v22 = vmul.f32 0.03125, %v4530_v10  ;;  %v4527_v58 = vpop.xlane.xlu1 %4526  ;;  %4610 = vadd.xlane.f32.xlu1 %v4609_v33  ;;  %v4588_v32 = vmul.f32 %v7045_v18, %v7045_v18 }
 0xa84   : > { %v4557_v15 = vmul.f32 0.03125, %v4527_v58  ;;  %v4587_v0 = vmul.f32 %v7049_v12, %v7049_v12  ;;  %v7115_v58 = vld [vmem:[%s7215_s9 + $0x6] ss:$0 sm:$0xff] }
 0xa85   : > { %v7057_v26 = vsub.f32 %v6965_v43, %v4558_v22  ;;  %v4618_v34 = vsel %vm774_vm2, %v4588_v32, 0.0 }
 0xa86   : > { %v7061_v59 = vsub.f32 %v6968_v57, %v4557_v15  ;;  %4619 = vadd.xlane.f32.xlu0 %v4618_v34  ;;  %v4536_v5 = vpop.xlane.xlu0 %4535  ;;  %v4615_v37 = vsel %vm774_vm2, %v4587_v0, 0.0 }
 0xa87   : > { %v4560_v61 = vmul.f32 0.03125, %v4536_v5  ;;  %v4533_v49 = vpop.xlane.xlu1 %4532  ;;  %4616 = vadd.xlane.f32.xlu1 %v4615_v37  ;;  %v4590_v17 = vmul.f32 %v7057_v26, %v7057_v26 }
 0xa88   : > { %v4559_v35 = vmul.f32 0.03125, %v4533_v49  ;;  %v4589_v43 = vmul.f32 %v7061_v59, %v7061_v59 }
 0xa89   : > { %v7069_v50 = vsub.f32 %v6977_v30, %v4560_v61  ;;  %v4624_v57 = vsel %vm774_vm2, %v4590_v17, 0.0 }
 0xa8a   : > { %v7073_v8 = vsub.f32 %v6980_v52, %v4559_v35  ;;  %4625 = vadd.xlane.f32.xlu0 %v4624_v57  ;;  %v4542_v41 = vpop.xlane.xlu0 %4541  ;;  %v4621_v4 = vsel %vm774_vm2, %v4589_v43, 0.0 }
 0xa8b   : > { %v4562_v3 = vmul.f32 0.03125, %v4542_v41  ;;  %v4539_v40 = vpop.xlane.xlu1 %4538  ;;  %4622 = vadd.xlane.f32.xlu1 %v4621_v4  ;;  %v4592_v1 = vmul.f32 %v7069_v50, %v7069_v50 }
 0xa8c   : > { %v4561_v11 = vmul.f32 0.03125, %v4539_v40  ;;  %v4591_v30 = vmul.f32 %v7073_v8, %v7073_v8 }
 0xa8d   : > { %v7081_v47 = vsub.f32 %v6989_v2, %v4562_v3  ;;  %v4630_v52 = vsel %vm774_vm2, %v4592_v1, 0.0 }
 0xa8e   : > { %v7085_v62 = vsub.f32 %v6992_v29, %v4561_v11  ;;  %4631 = vadd.xlane.f32.xlu0 %v4630_v52  ;;  %v4627_v42 = vsel %vm774_vm2, %v4591_v30, 0.0 }
 0xa8f   : > { %4628 = vadd.xlane.f32.xlu1 %v4627_v42  ;;  %v4594_v46 = vmul.f32 %v7081_v47, %v7081_v47 }
 0xa90   : > { %v4593_v21 = vmul.f32 %v7085_v62, %v7085_v62 }
 0xa91   : > { %v4636_v9 = vsel %vm774_vm2, %v4594_v46, 0.0 }
 0xa92   : > { %4637 = vadd.xlane.f32.xlu0 %v4636_v9  ;;  %v4633_v2 = vsel %vm774_vm2, %v4593_v21, 0.0 }
 0xa93   : > { %4634 = vadd.xlane.f32.xlu1 %v4633_v2 }
 0xab3   : > { %v4548_v13 = vpop.xlane.xlu0 %4547 }
 0xab4   : > { %v4564_v20 = vmul.f32 0.03125, %v4548_v13  ;;  %v4545_v29 = vpop.xlane.xlu1 %4544 }
 0xab5   : > { %v4563_v24 = vmul.f32 0.03125, %v4545_v29 }
 0xab6   : > { %v7095_v44 = vsub.f32 %v7001_v16, %v4564_v20 }
 0xab7   : > { %v7098_v31 = vsub.f32 %v7004_v28, %v4563_v24 }
 0xab8   : > { %v4596_v55 = vmul.f32 %v7095_v44, %v7095_v44 }
 0xab9   : > { %v4595_v63 = vmul.f32 %v7098_v31, %v7098_v31 }
 0xaba   : > { %v4642_v51 = vsel %vm774_vm2, %v4596_v55, 0.0 }
 0xabb   : > { %4643 = vadd.xlane.f32.xlu0 %v4642_v51  ;;  %v4639_v45 = vsel %vm774_vm2, %v4595_v63, 0.0 }
 0xabc   : > { %4640 = vadd.xlane.f32.xlu1 %v4639_v45 }
 0xafe   : > { %v4602_v27 = vpop.xlane.xlu0 %4601 }
 0xaff   : > { %v4646_v25 = vmul.f32 0.03125, %v4602_v27  ;;  %v4599_v36 = vpop.xlane.xlu1 %4598 }
 0xb00   : > { %v4645_v16 = vmul.f32 0.03125, %v4599_v36 }
 0xb01   : > { %v4662_v6 = vadd.f32 1e-05, %v4646_v25 }
 0xb02   : > { %v4661_v53 = vadd.f32 1e-05, %v4645_v16 }
 0xb03   : > { %5730 = vrsqrt.f32 %v4662_v6 }
 0xb04   : > { %5732 = vrsqrt.f32 %v4661_v53 }
 0xb0b   : > { %v4608_v28 = vpop.xlane.xlu0 %4607 }
 0xb0c   : > { %v4648_v48 = vmul.f32 0.03125, %v4608_v28  ;;  %v4605_v19 = vpop.xlane.xlu1 %4604 }
 0xb0d   : > { %v5731_v14 = vpop.eup %5730  ;;  %v4647_v22 = vmul.f32 0.03125, %v4605_v19 }
 0xb0e   : > { %v5733_v10 = vpop.eup %5732  ;;  %v4694_v33 = vmul.f32 %v5731_v14, %v7011_v38  ;;  %v4664_v15 = vadd.f32 1e-05, %v4648_v48 }
 0xb0f   : > { %v4693_v32 = vmul.f32 %v5733_v10, %v7014_v60  ;;  %v4663_v34 = vadd.f32 1e-05, %v4647_v22  ;;  %v4614_v5 = vpop.xlane.xlu0 %4613 }
 0xb10   : > { %v4714_v0 = vmul.f32 %v7109_v54, %v4694_v33  ;;  %5734 = vrsqrt.f32 %v4664_v15  ;;  %v4650_v37 = vmul.f32 0.03125, %v4614_v5  ;;  %v4611_v61 = vpop.xlane.xlu1 %4610 }
 0xb11   : > { %v4713_v38 = vmul.f32 %v7109_v54, %v4693_v32  ;;  %5736 = vrsqrt.f32 %v4663_v34  ;;  %v4649_v49 = vmul.f32 0.03125, %v4611_v61 }
 0xb12   : > { %v4734_v60 = vadd.f32 %v7115_v58, %v4714_v0  ;;  %v4666_v35 = vadd.f32 1e-05, %v4650_v37 }
 0xb13   : > { %v4733_v17 = vadd.f32 %v7115_v58, %v4713_v38  ;;  %v4665_v43 = vadd.f32 1e-05, %v4649_v49  ;;  %v4620_v57 = vpop.xlane.xlu0 %4619 }
 0xb14   : > { %4750 = vst.msk [vmem:[%s7124_s30 + $0x8] sm:$0xff] %vm774_vm2, %v4734_v60  ;;  %5738 = vrsqrt.f32 %v4666_v35  ;;  %v4652_v41 = vmul.f32 0.03125, %v4620_v57  ;;  %v4617_v4 = vpop.xlane.xlu1 %4616 }
 0xb15   : > { %4749 = vst.msk [vmem:[%s7124_s30] sm:$0xff] %vm774_vm2, %v4733_v17  ;;  %5740 = vrsqrt.f32 %v4665_v43  ;;  %v4651_v3 = vmul.f32 0.03125, %v4617_v4 }
 0xb16   : > { %v4668_v40 = vadd.f32 1e-05, %v4652_v41 }
 0xb17   : > { %v4667_v1 = vadd.f32 1e-05, %v4651_v3  ;;  %v4626_v11 = vpop.xlane.xlu0 %4625 }
 0xb18   : > { %5742 = vrsqrt.f32 %v4668_v40  ;;  %v4654_v30 = vmul.f32 0.03125, %v4626_v11  ;;  %v4623_v52 = vpop.xlane.xlu1 %4622 }
 0xb19   : > { %5744 = vrsqrt.f32 %v4667_v1  ;;  %v4653_v42 = vmul.f32 0.03125, %v4623_v52 }
 0xb1a   : > { %v5735_v46 = vpop.eup %5734  ;;  %v4670_v21 = vadd.f32 1e-05, %v4654_v30 }
 0xb1b   : > { %v5737_v9 = vpop.eup %5736  ;;  %v4696_v2 = vmul.f32 %v5735_v46, %v7023_v23  ;;  %v4669_v13 = vadd.f32 1e-05, %v4653_v42  ;;  %v4632_v20 = vpop.xlane.xlu0 %4631 }
 0xb1c   : > { %v4695_v29 = vmul.f32 %v5737_v9, %v7026_v7  ;;  %5746 = vrsqrt.f32 %v4670_v21  ;;  %v4656_v24 = vmul.f32 0.03125, %v4632_v20  ;;  %v4629_v55 = vpop.xlane.xlu1 %4628 }
 0xb1d   : > { %v4716_v63 = vmul.f32 %v7109_v54, %v4696_v2  ;;  %5748 = vrsqrt.f32 %v4669_v13  ;;  %v4655_v51 = vmul.f32 0.03125, %v4629_v55 }
 0xb1e   : > { %v5739_v45 = vpop.eup %5738  ;;  %v4715_v27 = vmul.f32 %v7109_v54, %v4695_v29  ;;  %v4672_v25 = vadd.f32 1e-05, %v4656_v24 }
 0xb1f   : > { %v5741_v36 = vpop.eup %5740  ;;  %v4736_v23 = vadd.f32 %v7115_v58, %v4716_v63  ;;  %v4698_v16 = vmul.f32 %v5739_v45, %v7033_v56  ;;  %v4671_v6 = vadd.f32 1e-05, %v4655_v51  ;;  %v4638_v7 = vpop.xlane.xlu0 %4637 }
 0xb20   : > { %v4735_v53 = vadd.f32 %v7115_v58, %v4715_v27  ;;  %v4697_v28 = vmul.f32 %v5741_v36, %v7037_v39  ;;  %5750 = vrsqrt.f32 %v4672_v25  ;;  %v4658_v14 = vmul.f32 0.03125, %v4638_v7  ;;  %v4635_v48 = vpop.xlane.xlu1 %4634 }
 0xb21   : > { %4752 = vst.msk [vmem:[%s7124_s30 + $0x18] sm:$0xff] %vm774_vm2, %v4736_v23  ;;  %v4718_v19 = vmul.f32 %v7109_v54, %v4698_v16  ;;  %5752 = vrsqrt.f32 %v4671_v6  ;;  %v4657_v10 = vmul.f32 0.03125, %v4635_v48 }
 0xb22   : > { %v5743_v33 = vpop.eup %5742  ;;  %4751 = vst.msk [vmem:[%s7124_s30 + $0x10] sm:$0xff] %vm774_vm2, %v4735_v53  ;;  %v4717_v56 = vmul.f32 %v7109_v54, %v4697_v28  ;;  %v4674_v22 = vadd.f32 1e-05, %v4658_v14 }
 0xb23   : > { %v5745_v32 = vpop.eup %5744  ;;  %v4738_v39 = vadd.f32 %v7115_v58, %v4718_v19  ;;  %v4700_v15 = vmul.f32 %v5743_v33, %v7045_v18  ;;  %v4673_v0 = vadd.f32 1e-05, %v4657_v10 }
 0xb24   : > { %v4737_v34 = vadd.f32 %v7115_v58, %v4717_v56  ;;  %v4699_v5 = vmul.f32 %v5745_v32, %v7049_v12  ;;  %5754 = vrsqrt.f32 %v4674_v22 }
 0xb25   : > { %4754 = vst.msk [vmem:[%s7124_s30 + $0x28] sm:$0xff] %vm774_vm2, %v4738_v39  ;;  %v4720_v38 = vmul.f32 %v7109_v54, %v4700_v15  ;;  %5756 = vrsqrt.f32 %v4673_v0 }
 0xb26   : > { %v5747_v37 = vpop.eup %5746  ;;  %4753 = vst.msk [vmem:[%s7124_s30 + $0x20] sm:$0xff] %vm774_vm2, %v4737_v34  ;;  %v4719_v61 = vmul.f32 %v7109_v54, %v4699_v5 }
 0xb27   : > { %v5749_v18 = vpop.eup %5748  ;;  %v4740_v60 = vadd.f32 %v7115_v58, %v4720_v38  ;;  %v4702_v49 = vmul.f32 %v5747_v37, %v7057_v26 }
 0xb28   : > { %v4739_v12 = vadd.f32 %v7115_v58, %v4719_v61  ;;  %v4701_v17 = vmul.f32 %v5749_v18, %v7061_v59 }
 0xb29   : > { %4756 = vst.msk [vmem:[%s7124_s30 + $0x38] sm:$0xff] %vm774_vm2, %v4740_v60  ;;  %v4722_v35 = vmul.f32 %v7109_v54, %v4702_v49 }
 0xb2a   : > { %v5751_v43 = vpop.eup %5750  ;;  %4755 = vst.msk [vmem:[%s7124_s30 + $0x30] sm:$0xff] %vm774_vm2, %v4739_v12  ;;  %v4721_v57 = vmul.f32 %v7109_v54, %v4701_v17 }
 0xb2b   : > { %v5753_v41 = vpop.eup %5752  ;;  %v4742_v4 = vadd.f32 %v7115_v58, %v4722_v35  ;;  %v4704_v26 = vmul.f32 %v5751_v43, %v7069_v50 }
 0xb2c   : > { %v4741_v3 = vadd.f32 %v7115_v58, %v4721_v57  ;;  %v4703_v59 = vmul.f32 %v5753_v41, %v7073_v8 }
 0xb2d   : > { %4758 = vst.msk [vmem:[%s7124_s30 + $0x48] sm:$0xff] %vm774_vm2, %v4742_v4  ;;  %v4724_v40 = vmul.f32 %v7109_v54, %v4704_v26 }
 0xb2e   : > { %v5755_v1 = vpop.eup %5754  ;;  %4757 = vst.msk [vmem:[%s7124_s30 + $0x40] sm:$0xff] %vm774_vm2, %v4741_v3  ;;  %v4723_v11 = vmul.f32 %v7109_v54, %v4703_v59 }
 0xb2f   : > { %v5757_v30 = vpop.eup %5756  ;;  %v4744_v52 = vadd.f32 %v7115_v58, %v4724_v40  ;;  %v4706_v50 = vmul.f32 %v5755_v1, %v7081_v47 }
 0xb30   : > { %v4743_v42 = vadd.f32 %v7115_v58, %v4723_v11  ;;  %v4705_v8 = vmul.f32 %v5757_v30, %v7085_v62 }
 0xb31   : > { %4760 = vst.msk [vmem:[%s7124_s30 + $0x58] sm:$0xff] %vm774_vm2, %v4744_v52  ;;  %v4726_v46 = vmul.f32 %v7109_v54, %v4706_v50 }
 0xb32   : > { %4759 = vst.msk [vmem:[%s7124_s30 + $0x50] sm:$0xff] %vm774_vm2, %v4743_v42  ;;  %v4725_v21 = vmul.f32 %v7109_v54, %v4705_v8 }
 0xb33   : > { %v4746_v9 = vadd.f32 %v7115_v58, %v4726_v46 }
 0xb34   : > { %v4745_v2 = vadd.f32 %v7115_v58, %v4725_v21 }
 0xb35   : > { %4762 = vst.msk [vmem:[%s7124_s30 + $0x68] sm:$0xff] %vm774_vm2, %v4746_v9 }
 0xb36   : > { %4761 = vst.msk [vmem:[%s7124_s30 + $0x60] sm:$0xff] %vm774_vm2, %v4745_v2 }
 0xb48   : > { %v4644_v47 = vpop.xlane.xlu0 %4643 }
 0xb49   : > { %v4660_v13 = vmul.f32 0.03125, %v4644_v47  ;;  %v4641_v62 = vpop.xlane.xlu1 %4640 }
 0xb4a   : > { %v4659_v20 = vmul.f32 0.03125, %v4641_v62 }
 0xb4b   : > { %v4676_v29 = vadd.f32 1e-05, %v4660_v13 }
 0xb4c   : > { %v4675_v24 = vadd.f32 1e-05, %v4659_v20 }
 0xb4d   : > { %5758 = vrsqrt.f32 %v4676_v29 }
 0xb4e   : > { %5760 = vrsqrt.f32 %v4675_v24 }
 0xb57   : > { %v5759_v55 = vpop.eup %5758 }
 0xb58   : > { %v5761_v63 = vpop.eup %5760  ;;  %v4708_v51 = vmul.f32 %v5759_v55, %v7095_v44 }
 0xb59   : > { %v4707_v45 = vmul.f32 %v5761_v63, %v7098_v31 }
 0xb5a   : > { %v4728_v27 = vmul.f32 %v7109_v54, %v4708_v51 }
 0xb5b   : > { %v4727_v25 = vmul.f32 %v7109_v54, %v4707_v45 }
 0xb5c   : > { %v4748_v36 = vadd.f32 %v7115_v58, %v4728_v27 }
 0xb5d   : > { %v4747_v23 = vadd.f32 %v7115_v58, %v4727_v25 }
 0xb5e   : > { %4764 = vst.msk [vmem:[%s7124_s30 + $0x78] sm:$0xff] %vm774_vm2, %v4748_v36 }
 0xb5f   : > { %4763 = vst.msk [vmem:[%s7124_s30 + $0x70] sm:$0xff] %vm774_vm2, %v4747_v23 }
 0xb60 PF: > { %s20_s13 = sadd.s32 1, %s5768_s13  }
 0xb61   : > { %p17_p4 = scmp.ge.s32.totalorder %s20_s13, 4  }
 0xb63   :  { %19 = sbr.rel (!%p17_p4) target bundleno = 1 (0x1), region = 90 }

</bundles_post_ra>
